<compile_context>
chip_gen: v6e
topology: v6e:2x2x1
jax: 0.10.0
libtpu: 0.0.40
codegen_flags: <defaults>
</compile_context>

<pallas_src>
import functools

import jax
import jax.numpy as jnp
from jax.experimental import pallas as pl
from jax.experimental.pallas import tpu as pltpu


def tiny_nerf_kernel(x_ref, w1_ref, b1_ref, w2_ref, b2_ref, w3_ref, b3_ref,
                     rgb_ref, dens_ref):
    # x tile arrives as f32; cast to bf16 at the dot input (free on the VPU).
    x = x_ref[...].astype(jnp.bfloat16)

    h1 = jnp.dot(x, w1_ref[...], preferred_element_type=jnp.float32) + b1_ref[...]
    h1 = jnp.maximum(h1, 0.0).astype(jnp.bfloat16)          # relu(layer1)

    h2 = jnp.dot(h1, w2_ref[...], preferred_element_type=jnp.float32) + b2_ref[...]
    h2 = jnp.maximum(h2, 0.0).astype(jnp.bfloat16)          # relu(layer2)

    # Fused heads: cols 0..2 = rgb_layer, col 3 = density.
    h3 = jnp.dot(h2, w3_ref[...], preferred_element_type=jnp.float32) + b3_ref[...]

    rgb_ref[...] = jax.nn.sigmoid(h3[:, :3]).astype(rgb_ref.dtype)
    dens_ref[...] = jnp.maximum(h3[:, 3:4], 0.0).astype(dens_ref.dtype)


def _round_up(n, m):
    return ((n + m - 1) // m) * m


def _vmem_limit_bytes(block_n, d_in, f):
    """Lane-padded, double-buffered VMEM estimate with headroom (bytes)."""
    lane = lambda c: _round_up(c, 128)
    dbl = 2  # pipeline double-buffering of in/out blocks
    x_in = dbl * block_n * lane(d_in) * 4        # f32 x tile
    rgb_o = dbl * block_n * lane(3) * 4          # f32 rgb out tile
    dens_o = dbl * block_n * lane(1) * 4         # f32 density out tile
    interm = 4 * block_n * lane(f) * 4           # h1/h2 f32 + bf16 copies (generous)
    weights = 256 * 1024                         # resident weights/biases, padded, x2
    est = x_in + rgb_o + dens_o + interm + weights + 4 * 1024 * 1024
    # Floor well below every chip's scoped default; cap <= 48 MiB so a block_n
    # tuned on v6e stays within v7x's 64 MiB physical VMEM with >=25% headroom.
    return int(min(48 * 2**20, max(16 * 2**20, est)))


def tiny_nerf_forward(x, params, *, block_n=2048):
    """x: (N, d_in) float32.  Returns (rgb (N,3), density (N,)) in float32."""
    N, d_in = x.shape
    f = params["w1"].shape[1]

    # Clamp block_n for small batches; keep it a multiple of 128 (sublane
    # packing for the bf16 intermediates and clean layouts everywhere).
    block_n = max(128, min(block_n, _round_up(N, 128)))
    assert block_n % 128 == 0, "block_n must be a multiple of 128"

    grid_len = pl.cdiv(N, block_n)   # ragged N handled by Mosaic block clipping

    def const_spec(shape):
        # Whole (small) weight/bias resident in VMEM for every grid step.
        return pl.BlockSpec(shape, lambda i: (0, 0))

    flops = 2 * N * (d_in * f + f * f + f * 4)
    bytes_accessed = (
        N * d_in * 4                         # f32 x reads (single HBM pass)
        + N * 3 * 4 + N * 1 * 4              # rgb + density writes (f32)
        + (d_in * f + f * f + f * 4) * 2     # bf16 weights
        + (f + f + 4) * 4                    # f32 biases
    )
    cost = pl.CostEstimate(flops=flops,
                           transcendentals=6 * N,   # sigmoid -> exp + recip x3 lanes
                           bytes_accessed=bytes_accessed)

    rgb, dens = pl.pallas_call(
        tiny_nerf_kernel,
        out_shape=(
            jax.ShapeDtypeStruct((N, 3), x.dtype),
            jax.ShapeDtypeStruct((N, 1), x.dtype),
        ),
        grid_spec=pltpu.PrefetchScalarGridSpec(
            num_scalar_prefetch=0,
            grid=(grid_len,),
            in_specs=[
                pl.BlockSpec((block_n, d_in), lambda i: (i, 0)),  # x tile (f32)
                const_spec((d_in, f)), const_spec((1, f)),        # layer1
                const_spec((f, f)),    const_spec((1, f)),        # layer2
                const_spec((f, 4)),    const_spec((1, 4)),        # fused heads
            ],
            out_specs=[
                pl.BlockSpec((block_n, 3), lambda i: (i, 0)),     # rgb
                pl.BlockSpec((block_n, 1), lambda i: (i, 0)),     # density
            ],
        ),
        compiler_params=pltpu.CompilerParams(
            dimension_semantics=("parallel",),
            vmem_limit_bytes=_vmem_limit_bytes(block_n, d_in, f)),
        cost_estimate=cost,
    )(x, params["w1"], params["b1"], params["w2"], params["b2"],
      params["w3"], params["b3"])

    # (N,1)->(N,) has identical HBM layout; this squeeze is effectively free.
    density = jnp.squeeze(dens, axis=-1)       # == torch.squeeze(density)
    return rgb, density


def init_params(key, num_encoding_functions, filter_size=128):
    """Weights in bf16 (MXU-native), biases in f32.

    rgb_layer and density are concatenated into one (filter_size, 4) head:
    cols 0..2 = rgb, col 3 = density.
    """
    d_in = 3 + 3 * 2 * num_encoding_functions
    keys = jax.random.split(key, 8)

    def linear(kw, kb, fan_in, fan_out):
        # PyTorch nn.Linear default init: U(-1/sqrt(fan_in), 1/sqrt(fan_in)).
        bound = 1.0 / jnp.sqrt(fan_in)
        w = jax.random.uniform(kw, (fan_in, fan_out), jnp.float32, -bound, bound)
        b = jax.random.uniform(kb, (1, fan_out), jnp.float32, -bound, bound)
        return w.astype(jnp.bfloat16), b

    w1, b1 = linear(keys[0], keys[1], d_in, filter_size)
    w2, b2 = linear(keys[2], keys[3], filter_size, filter_size)
    wrgb, brgb = linear(keys[4], keys[5], filter_size, 3)
    wd, bd = linear(keys[6], keys[7], filter_size, 1)
    w3 = jnp.concatenate([wrgb, wd], axis=1)          # (f, 4)
    b3 = jnp.concatenate([brgb, bd], axis=1)          # (1, 4)
    return {"w1": w1, "b1": b1, "w2": w2, "b2": b2, "w3": w3, "b3": b3}


def reference_forward(x, p):
    """Numerics-matched JAX reference (same bf16 rounding points as kernel)."""
    f32 = jnp.float32
    xb = x.astype(jnp.bfloat16).astype(f32)
    w1, w2, w3 = (p["w1"].astype(f32), p["w2"].astype(f32), p["w3"].astype(f32))
    h1 = jax.nn.relu(xb @ w1 + p["b1"])
    h1 = h1.astype(jnp.bfloat16).astype(f32)
    h2 = jax.nn.relu(h1 @ w2 + p["b2"])
    h2 = h2.astype(jnp.bfloat16).astype(f32)
    h3 = h2 @ w3 + p["b3"]
    rgb = jax.nn.sigmoid(h3[:, :3])
    density = jax.nn.relu(h3[:, 3])
    return rgb, density


if __name__ == "__main__":
    num_encoding_functions = 6          # d_in = 3 + 3*2*6 = 39
    filter_size = 128
    N = 1000                            # deliberately ragged (not % block_n)
    block_n = 256                       # grid = 4: even, 2 steps per v7x TC

    key = jax.random.PRNGKey(0)
    k_params, k_x = jax.random.split(key)
    params = init_params(k_params, num_encoding_functions, filter_size)
    x = jax.random.normal(k_x, (N, 3 + 3 * 2 * num_encoding_functions),
                          dtype=jnp.float32)

    fwd = jax.jit(functools.partial(tiny_nerf_forward, block_n=block_n))
    rgb, density = fwd(x, params)
    jax.block_until_ready((rgb, density))

    rgb_ref, dens_ref = reference_forward(x, params)
    assert rgb.shape == (N, 3) and density.shape == (N,)
    assert jnp.allclose(rgb, rgb_ref, atol=2e-3, rtol=2e-3), \
        float(jnp.max(jnp.abs(rgb - rgb_ref)))
    assert jnp.allclose(density, dens_ref, atol=5e-3, rtol=5e-3), \
        float(jnp.max(jnp.abs(density - dens_ref)))

    print("KERNEL_OK")
</pallas_src>

<mosaic_0001>
module attributes {stable_mosaic.version = 11 : i64} {
  func.func @tiny_nerf_kernel(%arg0: i32, %arg1: memref<256x39xf32, #tpu.memory_space<vmem>>, %arg2: memref<39x128xbf16, #tpu.memory_space<vmem>>, %arg3: memref<1x128xf32, #tpu.memory_space<vmem>>, %arg4: memref<128x128xbf16, #tpu.memory_space<vmem>>, %arg5: memref<1x128xf32, #tpu.memory_space<vmem>>, %arg6: memref<128x4xbf16, #tpu.memory_space<vmem>>, %arg7: memref<1x4xf32, #tpu.memory_space<vmem>>, %arg8: memref<256x3xf32, #tpu.memory_space<vmem>>, %arg9: memref<256x1xf32, #tpu.memory_space<vmem>>) attributes {dimension_semantics = [#tpu.dimension_semantics<parallel>], iteration_bounds = array<i64: 4>, scalar_prefetch = 0 : i64, scratch_operands = 0 : i64, tpu.core_type = #tpu.core_type<tc>, window_params = [{transform_indices = @transform_0, window_bounds = array<i64: 256, 39>}, {pipeline_mode = #tpu.pipeline_mode<synchronous>, transform_indices = @transform_1, window_bounds = array<i64: 39, 128>}, {pipeline_mode = #tpu.pipeline_mode<synchronous>, transform_indices = @transform_2, window_bounds = array<i64: 1, 128>}, {pipeline_mode = #tpu.pipeline_mode<synchronous>, transform_indices = @transform_3, window_bounds = array<i64: 128, 128>}, {pipeline_mode = #tpu.pipeline_mode<synchronous>, transform_indices = @transform_4, window_bounds = array<i64: 1, 128>}, {pipeline_mode = #tpu.pipeline_mode<synchronous>, transform_indices = @transform_5, window_bounds = array<i64: 128, 4>}, {pipeline_mode = #tpu.pipeline_mode<synchronous>, transform_indices = @transform_6, window_bounds = array<i64: 1, 4>}, {transform_indices = @transform_7, window_bounds = array<i64: 256, 3>}, {transform_indices = @transform_8, window_bounds = array<i64: 256, 1>}]} {
    %c0 = arith.constant 0 : index
    %c0_0 = arith.constant 0 : index
    %0 = vector.load %arg1[%c0, %c0_0] : memref<256x39xf32, #tpu.memory_space<vmem>>, vector<256x39xf32>
    %1 = arith.truncf %0 : vector<256x39xf32> to vector<256x39xbf16>
    %c0_1 = arith.constant 0 : index
    %c0_2 = arith.constant 0 : index
    %2 = vector.load %arg2[%c0_1, %c0_2] : memref<39x128xbf16, #tpu.memory_space<vmem>>, vector<39x128xbf16>
    %cst = arith.constant dense<0.000000e+00> : vector<256x128xf32>
    %3 = tpu.matmul %1, %2, %cst {dimension_numbers = #tpu.dot_dimension_numbers<[1], [0], [0], [1], [0, 0, 1, 1], [], []>} : vector<256x39xbf16>, vector<39x128xbf16>, vector<256x128xf32> -> vector<256x128xf32>
    %c0_3 = arith.constant 0 : index
    %c0_4 = arith.constant 0 : index
    %4 = vector.load %arg3[%c0_3, %c0_4] : memref<1x128xf32, #tpu.memory_space<vmem>>, vector<1x128xf32>
    %5 = vector.broadcast %4 : vector<1x128xf32> to vector<256x128xf32>
    %6 = arith.addf %3, %5 : vector<256x128xf32>
    %cst_5 = arith.constant 0.000000e+00 : f32
    %7 = vector.broadcast %cst_5 : f32 to vector<256x128xf32>
    %8 = arith.maximumf %6, %7 : vector<256x128xf32>
    %9 = arith.truncf %8 : vector<256x128xf32> to vector<256x128xbf16>
    %c0_6 = arith.constant 0 : index
    %c0_7 = arith.constant 0 : index
    %10 = vector.load %arg4[%c0_6, %c0_7] : memref<128x128xbf16, #tpu.memory_space<vmem>>, vector<128x128xbf16>
    %cst_8 = arith.constant dense<0.000000e+00> : vector<256x128xf32>
    %11 = tpu.matmul %9, %10, %cst_8 {dimension_numbers = #tpu.dot_dimension_numbers<[1], [0], [0], [1], [0, 0, 1, 1], [], []>} : vector<256x128xbf16>, vector<128x128xbf16>, vector<256x128xf32> -> vector<256x128xf32>
    %c0_9 = arith.constant 0 : index
    %c0_10 = arith.constant 0 : index
    %12 = vector.load %arg5[%c0_9, %c0_10] : memref<1x128xf32, #tpu.memory_space<vmem>>, vector<1x128xf32>
    %13 = vector.broadcast %12 : vector<1x128xf32> to vector<256x128xf32>
    %14 = arith.addf %11, %13 : vector<256x128xf32>
    %cst_11 = arith.constant 0.000000e+00 : f32
    %15 = vector.broadcast %cst_11 : f32 to vector<256x128xf32>
    %16 = arith.maximumf %14, %15 : vector<256x128xf32>
    %17 = arith.truncf %16 : vector<256x128xf32> to vector<256x128xbf16>
    %c0_12 = arith.constant 0 : index
    %c0_13 = arith.constant 0 : index
    %18 = vector.load %arg6[%c0_12, %c0_13] : memref<128x4xbf16, #tpu.memory_space<vmem>>, vector<128x4xbf16>
    %cst_14 = arith.constant dense<0.000000e+00> : vector<256x4xf32>
    %19 = tpu.matmul %17, %18, %cst_14 {dimension_numbers = #tpu.dot_dimension_numbers<[1], [0], [0], [1], [0, 0, 1, 1], [], []>} : vector<256x128xbf16>, vector<128x4xbf16>, vector<256x4xf32> -> vector<256x4xf32>
    %c0_15 = arith.constant 0 : index
    %c0_16 = arith.constant 0 : index
    %20 = vector.load %arg7[%c0_15, %c0_16] : memref<1x4xf32, #tpu.memory_space<vmem>>, vector<1x4xf32>
    %21 = vector.broadcast %20 : vector<1x4xf32> to vector<256x4xf32>
    %22 = arith.addf %19, %21 : vector<256x4xf32>
    %23 = vector.extract_strided_slice %22 {offsets = [0, 0], sizes = [256, 3], strides = [1, 1]} : vector<256x4xf32> to vector<256x3xf32>
    %24 = arith.negf %23 : vector<256x3xf32>
    %25 = math.exp %24 : vector<256x3xf32>
    %cst_17 = arith.constant 1.000000e+00 : f32
    %26 = vector.broadcast %cst_17 : f32 to vector<256x3xf32>
    %27 = arith.addf %26, %25 : vector<256x3xf32>
    %28 = arith.divf %26, %27 : vector<256x3xf32>
    %c0_18 = arith.constant 0 : index
    %c0_19 = arith.constant 0 : index
    %29 = vector.load %arg8[%c0_18, %c0_19] : memref<256x3xf32, #tpu.memory_space<vmem>>, vector<256x3xf32>
    tpu.vector_store %arg8[%c0_18, %c0_19], %28 {strides = array<i32>} : memref<256x3xf32, #tpu.memory_space<vmem>>, vector<256x3xf32>,
    %30 = vector.extract_strided_slice %22 {offsets = [0, 3], sizes = [256, 1], strides = [1, 1]} : vector<256x4xf32> to vector<256x1xf32>
    %cst_20 = arith.constant 0.000000e+00 : f32
    %31 = vector.broadcast %cst_20 : f32 to vector<256x1xf32>
    %32 = arith.maximumf %30, %31 : vector<256x1xf32>
    %c0_21 = arith.constant 0 : index
    %c0_22 = arith.constant 0 : index
    %33 = vector.load %arg9[%c0_21, %c0_22] : memref<256x1xf32, #tpu.memory_space<vmem>>, vector<256x1xf32>
    tpu.vector_store %arg9[%c0_21, %c0_22], %32 {strides = array<i32>} : memref<256x1xf32, #tpu.memory_space<vmem>>, vector<256x1xf32>,
    return
  }
  func.func @transform_0(%arg0: i32) -> (i32, i32) {
    %c0_i32 = arith.constant 0 : i32
    %c0_i32_0 = arith.constant 0 : i32
    return %arg0, %c0_i32 : i32, i32
  }
  func.func @transform_1(%arg0: i32) -> (i32, i32) {
    %c0_i32 = arith.constant 0 : i32
    %c0_i32_0 = arith.constant 0 : i32
    %c0_i32_1 = arith.constant 0 : i32
    return %c0_i32, %c0_i32_0 : i32, i32
  }
  func.func @transform_2(%arg0: i32) -> (i32, i32) {
    %c0_i32 = arith.constant 0 : i32
    %c0_i32_0 = arith.constant 0 : i32
    %c0_i32_1 = arith.constant 0 : i32
    return %c0_i32, %c0_i32_0 : i32, i32
  }
  func.func @transform_3(%arg0: i32) -> (i32, i32) {
    %c0_i32 = arith.constant 0 : i32
    %c0_i32_0 = arith.constant 0 : i32
    %c0_i32_1 = arith.constant 0 : i32
    return %c0_i32, %c0_i32_0 : i32, i32
  }
  func.func @transform_4(%arg0: i32) -> (i32, i32) {
    %c0_i32 = arith.constant 0 : i32
    %c0_i32_0 = arith.constant 0 : i32
    %c0_i32_1 = arith.constant 0 : i32
    return %c0_i32, %c0_i32_0 : i32, i32
  }
  func.func @transform_5(%arg0: i32) -> (i32, i32) {
    %c0_i32 = arith.constant 0 : i32
    %c0_i32_0 = arith.constant 0 : i32
    %c0_i32_1 = arith.constant 0 : i32
    return %c0_i32, %c0_i32_0 : i32, i32
  }
  func.func @transform_6(%arg0: i32) -> (i32, i32) {
    %c0_i32 = arith.constant 0 : i32
    %c0_i32_0 = arith.constant 0 : i32
    %c0_i32_1 = arith.constant 0 : i32
    return %c0_i32, %c0_i32_0 : i32, i32
  }
  func.func @transform_7(%arg0: i32) -> (i32, i32) {
    %c0_i32 = arith.constant 0 : i32
    %c0_i32_0 = arith.constant 0 : i32
    return %arg0, %c0_i32 : i32, i32
  }
  func.func @transform_8(%arg0: i32) -> (i32, i32) {
    %c0_i32 = arith.constant 0 : i32
    %c0_i32_0 = arith.constant 0 : i32
    return %arg0, %c0_i32 : i32, i32
  }
}

</mosaic_0001>

<bundles_post_ra>
// kernel: tiny_nerf_forward.1
= control target key start
LH: loop header
LB: loop body
LE: loop exit
PB: predicated region body
PF: predicated region fallthrough
CT: control target
= control target key end

     0   :  { %s3797_s0 = inlined_call_operand.vmem [shape: f32[1000,39], index: 0, kind: input, shape index: {}]   ;;  %s3798_s1 = inlined_call_operand.vmem [shape: bf16[39,128], index: 1, kind: input, shape index: {}]   ;;  %s3799_s2 = inlined_call_operand.vmem [shape: f32[1,128], index: 2, kind: input, shape index: {}]   ;;  %s3800_s3 = inlined_call_operand.vmem [shape: bf16[128,128], index: 3, kind: input, shape index: {}]   ;;  %s3801_s4 = inlined_call_operand.vmem [shape: f32[1,128], index: 4, kind: input, shape index: {}]   ;;  %s3802_s5 = inlined_call_operand.vmem [shape: bf16[128,4], index: 5, kind: input, shape index: {}]   ;;  %s3803_s6 = inlined_call_operand.vmem [shape: f32[1,4], index: 6, kind: input, shape index: {}]   ;;  %s3804_s7 = inlined_call_operand.vmem [shape: f32[1000,3], index: 7, kind: output, shape index: {0}]   ;;  %s3805_s8 = inlined_call_operand.vmem [shape: f32[1000,1], index: 8, kind: output, shape index: {1}]  }
   0x1   :  { %3806 = sst [smem:[#allocation4_spill]] %s3797_s0 }
   0x2   :  { %s3090_s27 = smov 0   ;;  %s3092_s28 = smov 0  }
   0x3   :  { %s3094_s29 = smov 0  }
   0x4 LB: > { %s3103_s30 = sadd.s32 4294967295, %s2977_s29   ;;  %s3105_s9 = sadd.s32 1, %s2977_s29   ;;  %s2977_s29 = sphi %s3094_s29, %s3821_s29   ;;  %s2973_s28 = sphi %s3092_s28, %s3820_s28   ;;  %s2969_s27 = sphi %s3090_s27, %s3819_s27  }
   0x5   : > { %s175_s10 = ssub.s32 %s2977_s29, %s3105_s9  ;;  %s178_s11 = sadd.s32 1, %s2973_s28 }
   0x6   : > { %p176_p0 = scmp.eq.s32.totalorder %s175_s10, 0  ;;  %p188_p1 = scmp.ne.s32.totalorder %s2973_s28, %s2969_s27 }
   0x7   : > { %p189_p2 = scmp.eq.s32.totalorder %s3103_s30, 3  ;;  %p2270_p3 = scmp.ge.s32.totalorder %s2977_s29, 1 }
   0x8   : > { %s3113_s12 = scalar_select %p176_p0, %s2973_s28, %s178_s11  }
   0x9   : > { %p3115_p4 = por %p189_p2, %p188_p1  ;;  %p274_p5 = scmp.lt.s32.totalorder %s2977_s29, 5 }
   0xb   : > { %p275_p6 = pnand %p2270_p3, %p274_p5 }
   0xc   : > { %s3123_s16 = sshll.u32 (!%p275_p6), %s3103_s30, 5  ;;  %s3808_s0 = sld [smem:[#allocation4_spill]] (!%p275_p6) }
   0xd   : > { %278 = sbr.rel (%p275_p6) target bundleno = 927 (0x39f), region = 48  ;;  %p320_p7 = scmp.lt.s32.totalorder (!%p275_p6), %s3123_s16, 124 }
   0xe   : > { %s306_s20 = sand.u32 (!%p275_p6), 1, %s2969_s27  }
   0xf   : > { %s3354_s21 = sshll.u32 (!%p275_p6), %s306_s20, 8 }
  0x10   : > { %s3363_s27 = scalar_lea.vmem (!%p275_p6), [#allocation2], %s3354_s21  }
  0x12   : > { %v2744_v0 = vld [vmem:[%s3798_s1 + $0x10] ss:$0 sps:$4 sm:$0xff]   ;;  %vm464_vm0 = vcmask 1042432   ;;  %vm465_vm1 = vcmask 1043456   ;;  %v3043_v1 = vmov 65535   ;;  %v2745_v5 = vld [vmem:[%s3798_s1 + $0x8] sm:$0xff]  }
  0x13   : > { %v466_v2 = vsel %vm464_vm0, 4294967295, %v3043_v1  ;;  %s321_s19 = scalar_select %p320_p7, %s3123_s16, 124  ;;  %v2746_v6 = vld [vmem:[%s3798_s1] sm:$0xff]   ;;  %vm415_vm2 = vcmask 318464   ;;  %v2747_v14 = vld [vmem:[%s3800_s3 + $0x38] sm:$0xff]   ;;  %v2748_v25 = vld [vmem:[%s3800_s3 + $0x30] sm:$0xff]  }
  0x14   : > { %v467_v3 = vsel %vm465_vm1, %v466_v2, 0  ;;  %v2749_v33 = vld [vmem:[%s3800_s3 + $0x28] sm:$0xff]   ;;  %v2750_v39 = vld [vmem:[%s3800_s3 + $0x20] sm:$0xff]   ;;  %v2751_v49 = vld [vmem:[%s3800_s3 + $0x18] sm:$0xff]   ;;  %vm1384_vm3 = vcmask 23552   ;;  %vm1577_vm4 = vcmask 7168  }
  0x15   : > { %v469_v4 = vand.u32 %v2744_v0, %v467_v3  ;;  %s2274_s22 = sshll.u32 %s321_s19, 3  ;;  %v2752_v60 = vld [vmem:[%s3800_s3 + $0x10] sm:$0xff]   ;;  %v2753_v61 = vld [vmem:[%s3800_s3 + $0x8] sm:$0xff]   ;;  %v2754_v62 = vld [vmem:[%s3800_s3] sm:$0xff]   ;;  %s3044_s19 = smov 125  }
  0x16   : > { %s3136_s25 = scalar_lea.vmem %s3808_s0, %s2274_s22  ;;  %v2755_v63 = vld [vmem:[%s3802_s5 + $0x38] sm:$0xff]   ;;  %v2756_v0 = vld [vmem:[%s3802_s5 + $0x30] sm:$0xff]   ;;  %v2757_v1 = vld [vmem:[%s3802_s5 + $0x28] sm:$0xff]   ;;  %s3463_s22 = scalar_lea.vmem [#allocation3], %s3354_s21  }
  0x17   : > { %2450 = vmatprep.subr.bf16.mxu0 %v469_v4  ;;  %2584 = vmatprep.subr.bf16.mxu1 %v469_v4  ;;  %v340_v7 = vld [vmem:[%s3136_s25] sm:$0xff]  ;;  %v341_v8 = vld [vmem:[%s3136_s25 + $0x8] sm:$0xff]  ;;  %v342_v10 = vld [vmem:[%s3136_s25 + $0x10] sm:$0xff]  ;;  %s1622_s23 = ssub.s32 (%p3115_p4), 125, %s3123_s16  ;;  %s2377_s24 = sshll.u32 (%p3115_p4), %s3103_s30, 8 }
  0x18   : > { %2451 = vmatpush3.bf16.msra.mxu0 %v469_v4  ;;  %2587 = vmatpush3.bf16.msra.mxu1 %v469_v4  ;;  %v372_v9 = vpack.c.bf16 %v341_v8, %v340_v7  ;;  %v343_v11 = vld [vmem:[%s3136_s25 + $0x18] sm:$0xff]  ;;  %v344_v12 = vld [vmem:[%s3136_s25 + $0x20] sm:$0xff]  ;;  %v345_v13 = vld [vmem:[%s3136_s25 + $0x28] sm:$0xff]  ;;  %p1623_p8 = scmp.lt.s32.totalorder (%p3115_p4), %s1622_s23, 32  ;;  %s3536_s29 = scalar_lea.vmem (%p3115_p4), %s3804_s7, %s2377_s24  }
  0x19   : > { %2452 = vmatprep.subr.bf16.mxu0 %v2745_v5  ;;  %2585 = vmatprep.subr.bf16.mxu1 %v2745_v5  ;;  %v373_v15 = vpack.c.bf16 %v343_v11, %v342_v10  ;;  %v374_v16 = vpack.c.bf16 %v345_v13, %v344_v12  ;;  %v356_v17 = vld [vmem:[%s3136_s25 + $0x80] sm:$0xff]  ;;  %v357_v18 = vld [vmem:[%s3136_s25 + $0x88] sm:$0xff]  ;;  %v358_v20 = vld [vmem:[%s3136_s25 + $0x90] sm:$0xff] }
  0x1a   : > { %2456 = vmatprep.mubr.msk.bf16.mxu0 %vm415_vm2, %v372_v9  ;;  %v380_v19 = vpack.c.bf16 %v357_v18, %v356_v17  ;;  %v359_v21 = vld [vmem:[%s3136_s25 + $0x98] sm:$0xff]  ;;  %v360_v22 = vld [vmem:[%s3136_s25 + $0xa0] sm:$0xff]  ;;  %v361_v24 = vld [vmem:[%s3136_s25 + $0xa8] sm:$0xff] }
  0x1b   : > { %v381_v23 = vpack.c.bf16 %v359_v21, %v358_v20  ;;  %v346_v26 = vld [vmem:[%s3136_s25 + $0x30] sm:$0xff]  ;;  %v347_v27 = vld [vmem:[%s3136_s25 + $0x38] sm:$0xff]  ;;  %v348_v28 = vld [vmem:[%s3136_s25 + $0x40] sm:$0xff]  ;;  %v382_v29 = vpack.c.bf16 %v361_v24, %v360_v22 }
  0x1c   : > { %2453 = vmatpush3.bf16.msra.mxu0 %v2745_v5  ;;  %2588 = vmatpush3.bf16.msra.mxu1 %v2745_v5  ;;  %v349_v30 = vld [vmem:[%s3136_s25 + $0x48] sm:$0xff]  ;;  %v362_v31 = vld [vmem:[%s3136_s25 + $0xb0] sm:$0xff]  ;;  %v363_v32 = vld [vmem:[%s3136_s25 + $0xb8] sm:$0xff]  ;;  %v375_v36 = vpack.c.bf16 %v347_v27, %v346_v26 }
  0x1d   : > { %2454 = vmatprep.subr.bf16.mxu0 %v2746_v6  ;;  %2586 = vmatprep.subr.bf16.mxu1 %v2746_v6  ;;  %v364_v34 = vld [vmem:[%s3136_s25 + $0xc0] sm:$0xff]  ;;  %v365_v35 = vld [vmem:[%s3136_s25 + $0xc8] sm:$0xff]  ;;  %v376_v37 = vpack.c.bf16 %v349_v30, %v348_v28  ;;  %v383_v38 = vpack.c.bf16 %v363_v32, %v362_v31  ;;  %v350_v41 = vld [vmem:[%s3136_s25 + $0x50] sm:$0xff] }
  0x1e   : > { %2472 = vmatprep.mubr.msk.bf16.mxu1 %vm415_vm2, %v380_v19  ;;  %v384_v40 = vpack.c.bf16 %v365_v35, %v364_v34  ;;  %v351_v42 = vld [vmem:[%s3136_s25 + $0x58] sm:$0xff]  ;;  %v352_v43 = vld [vmem:[%s3136_s25 + $0x60] sm:$0xff]  ;;  %v353_v44 = vld [vmem:[%s3136_s25 + $0x68] sm:$0xff] }
  0x1f   : > { %v366_v45 = vld [vmem:[%s3136_s25 + $0xd0] sm:$0xff]  ;;  %v367_v46 = vld [vmem:[%s3136_s25 + $0xd8] sm:$0xff]  ;;  %v368_v47 = vld [vmem:[%s3136_s25 + $0xe0] sm:$0xff]  ;;  %v377_v50 = vpack.c.bf16 %v351_v42, %v350_v41  ;;  %v378_v51 = vpack.c.bf16 %v353_v44, %v352_v43 }
  0x20   : > { %2455 = vmatpush3.bf16.msra.mxu0 %v2746_v6  ;;  %2589 = vmatpush3.bf16.msra.mxu1 %v2746_v6  ;;  %v369_v48 = vld [vmem:[%s3136_s25 + $0xe8] sm:$0xff]  ;;  %v385_v52 = vpack.c.bf16 %v367_v46, %v366_v45  ;;  %v354_v54 = vld [vmem:[%s3136_s25 + $0x70] sm:$0xff]  ;;  %v355_v55 = vld [vmem:[%s3136_s25 + $0x78] sm:$0xff] }
  0x21   : > { %2488 = vmatprep.subr.bf16.mxu1 %v2747_v14  ;;  %v386_v53 = vpack.c.bf16 %v369_v48, %v368_v47  ;;  %v370_v56 = vld [vmem:[%s3136_s25 + $0xf0] sm:$0xff]  ;;  %v371_v57 = vld [vmem:[%s3136_s25 + $0xf8] sm:$0xff]  ;;  %v379_v58 = vpack.c.bf16 %v355_v55, %v354_v54  ;;  %2536 = vmatprep.subr.bf16.mxu0 %v2755_v63  ;;  %v2758_v2 = vld [vmem:[%s3802_s5 + $0x20] sm:$0xff]  }
  0x22   : > { %v387_v59 = vpack.c.bf16 %v371_v57, %v370_v56  ;;  %v2759_v3 = vld [vmem:[%s3802_s5 + $0x18] sm:$0xff]   ;;  %v3230_v7 = vld [vmem:[%s3799_s2] ss:$0 sm:$0xff] }
  0x23   : > { %2457 = vmatmul.mubr.msk.bf16.vlgmr.msra.gmra.mxu0 %vm415_vm2, %v373_v15  ;;  %2473 = vmatmul.mubr.msk.bf16.vlgmr.msra.gmra.mxu1 %vm415_vm2, %v381_v23 }
  0x24   : > { %2460 = vmatprep.mubr.msk.bf16.mxu0 %vm415_vm2, %v374_v16  ;;  %2476 = vmatprep.mubr.msk.bf16.mxu1 %vm415_vm2, %v382_v29 }
  0x25   : > { %2489 = vmatpush3.bf16.msra.mxu1 %v2747_v14  ;;  %2537 = vmatpush3.bf16.msra.mxu0 %v2755_v63 }
  0x26   : > { %2490 = vmatprep.subr.bf16.mxu1 %v2748_v25  ;;  %2538 = vmatprep.subr.bf16.mxu0 %v2756_v0 }
  0x29   : > { %2491 = vmatpush3.bf16.msra.mxu1 %v2748_v25  ;;  %2539 = vmatpush3.bf16.msra.mxu0 %v2756_v0 }
  0x2a   : > { %2492 = vmatprep.subr.bf16.mxu1 %v2749_v33  ;;  %2540 = vmatprep.subr.bf16.mxu0 %v2757_v1 }
  0x2b   : > { %2461 = vmatmul.mubr.msk.bf16.gmra.mxu0 %vm415_vm2, %v375_v36  ;;  %2477 = vmatmul.mubr.msk.bf16.gmra.mxu1 %vm415_vm2, %v383_v38 }
  0x2c   : > { %2464 = vmatprep.mubr.msk.bf16.mxu0 %vm415_vm2, %v376_v37  ;;  %2480 = vmatprep.mubr.msk.bf16.mxu1 %vm415_vm2, %v384_v40 }
  0x2d   : > { %2493 = vmatpush3.bf16.msra.mxu1 %v2749_v33  ;;  %2541 = vmatpush3.bf16.msra.mxu0 %v2757_v1 }
  0x2e   : > { %2494 = vmatprep.subr.bf16.mxu1 %v2750_v39  ;;  %2542 = vmatprep.subr.bf16.mxu0 %v2758_v2 }
  0x31   : > { %2495 = vmatpush3.bf16.msra.mxu1 %v2750_v39  ;;  %2543 = vmatpush3.bf16.msra.mxu0 %v2758_v2 }
  0x32   : > { %2496 = vmatprep.subr.bf16.mxu1 %v2751_v49  ;;  %2544 = vmatprep.subr.bf16.mxu0 %v2759_v3 }
  0x33   : > { %2465 = vmatmul.mubr.msk.bf16.gmra.mxu0 %vm415_vm2, %v377_v50  ;;  %2481 = vmatmul.mubr.msk.bf16.gmra.mxu1 %vm415_vm2, %v385_v52 }
  0x34   : > { %2468 = vmatprep.mubr.msk.bf16.mxu0 %vm415_vm2, %v378_v51  ;;  %2484 = vmatprep.mubr.msk.bf16.mxu1 %vm415_vm2, %v386_v53 }
  0x35   : > { %2497 = vmatpush3.bf16.msra.mxu1 %v2751_v49  ;;  %2545 = vmatpush3.bf16.msra.mxu0 %v2759_v3 }
  0x36   : > { %2498 = vmatprep.subr.bf16.mxu1 %v2752_v60 }
  0x39   : > { %2499 = vmatpush3.bf16.msra.mxu1 %v2752_v60 }
  0x3a   : > { %2500 = vmatprep.subr.bf16.mxu1 %v2753_v61 }
  0x3b   : > { %2469 = vmatmul.mubr.msk.bf16.gmra.mxu0 %vm415_vm2, %v379_v58  ;;  %2485 = vmatmul.mubr.msk.bf16.gmra.mxu1 %vm415_vm2, %v387_v59 }
  0x3d   : > { %2501 = vmatpush3.bf16.msra.mxu1 %v2753_v61 }
  0x3e   : > { %2502 = vmatprep.subr.bf16.mxu1 %v2754_v62 }
  0x41   : > { %2503 = vmatpush3.bf16.msra.mxu1 %v2754_v62 }
  0xe3   : > { %v2458_v4 = vpop.f32.mrf.mxu0  ;;  %v3225_v5 = vpop.f32.mrf.mxu1 }
  0xe4   : > { %v514_v13 = vadd.f32 %v2458_v4, %v3230_v7 }
  0xe5   : > { %v505_v6 = vpop.f32.mrf.mxu0  ;;  %v569_v8 = vpop.f32.mrf.mxu1 }
  0xe6   : > { %v506_v10 = vadd.f32 %v3230_v7, %v505_v6  ;;  %v634_v22 = vmax.f32 %v514_v13, 0.0  ;;  %v570_v58 = vadd.f32 %v3230_v7, %v569_v8 }
  0xe7   : > { %v2459_v9 = vpop.f32.mrf.mxu0  ;;  %v3234_v12 = vpop.f32.mrf.mxu1 }
  0xe8   : > { %v517_v11 = vadd.f32 %v2459_v9, %v3230_v7  ;;  %v632_v19 = vmax.f32 %v506_v10, 0.0  ;;  %v648_v3 = vmax.f32 %v570_v58, 0.0  ;;  %v3289_v58 = vld [vmem:[%s3801_s4] ss:$0 sm:$0xff] }
  0xe9   : > { %v508_v14 = vpop.f32.mrf.mxu0  ;;  %v572_v16 = vpop.f32.mrf.mxu1 }
  0xea   : > { %v509_v15 = vadd.f32 %v3230_v7, %v508_v14  ;;  %v635_v17 = vmax.f32 %v517_v11, 0.0  ;;  %v573_v59 = vadd.f32 %v3230_v7, %v572_v16 }
  0xeb   : > { %v2462_v18 = vpop.f32.mrf.mxu0  ;;  %v3238_v21 = vpop.f32.mrf.mxu1 }
  0xec   : > { %v633_v20 = vmax.f32 %v509_v15, 0.0  ;;  %v665_v26 = vpack.c.bf16 %v635_v17, %v634_v22  ;;  %v530_v31 = vadd.f32 %v2462_v18, %v3230_v7  ;;  %v649_v6 = vmax.f32 %v573_v59, 0.0 }
  0xed   : > { %v521_v23 = vpop.f32.mrf.mxu0  ;;  %v585_v25 = vpop.f32.mrf.mxu1  ;;  %v578_v18 = vadd.f32 %v3225_v5, %v3230_v7  ;;  %v594_v5 = vadd.f32 %v3238_v21, %v3230_v7 }
  0xee   : > { %v664_v24 = vpack.c.bf16 %v633_v20, %v632_v19  ;;  %v522_v28 = vadd.f32 %v3230_v7, %v521_v23  ;;  %v638_v39 = vmax.f32 %v530_v31, 0.0  ;;  %v672_v15 = vpack.c.bf16 %v649_v6, %v648_v3 }
  0xef   : > { %v2463_v27 = vpop.f32.mrf.mxu0  ;;  %v3242_v30 = vpop.f32.mrf.mxu1  ;;  %v586_v16 = vadd.f32 %v3230_v7, %v585_v25  ;;  %v581_v20 = vadd.f32 %v3234_v12, %v3230_v7 }
  0xf0   : > { %v533_v29 = vadd.f32 %v2463_v27, %v3230_v7  ;;  %2504 = vmatprep.mubr.bf16.mxu1 %v664_v24  ;;  %v636_v37 = vmax.f32 %v522_v28, 0.0  ;;  %v597_v12 = vadd.f32 %v3242_v30, %v3230_v7 }
  0xf1   : > { %v524_v32 = vpop.f32.mrf.mxu0  ;;  %2505 = vmatmul.mubr.bf16.vlgmr.msra.gmra.mxu1 %v665_v26  ;;  %v588_v36 = vpop.f32.mrf.mxu1  ;;  %v652_v23 = vmax.f32 %v586_v16, 0.0  ;;  %v650_v26 = vmax.f32 %v578_v18, 0.0  ;;  %v651_v27 = vmax.f32 %v581_v20, 0.0 }
  0xf2   : > { %v525_v33 = vadd.f32 %v3230_v7, %v524_v32  ;;  %v639_v34 = vmax.f32 %v533_v29, 0.0  ;;  %v589_v17 = vadd.f32 %v3230_v7, %v588_v36  ;;  %v654_v36 = vmax.f32 %v594_v5, 0.0 }
  0xf3   : > { %v2466_v35 = vpop.f32.mrf.mxu0  ;;  %v3246_v44 = vpop.f32.mrf.mxu1  ;;  %v673_v32 = vpack.c.bf16 %v651_v27, %v650_v26 }
  0xf4   : > { %v637_v38 = vmax.f32 %v525_v33, 0.0  ;;  %v667_v42 = vpack.c.bf16 %v639_v34, %v638_v39  ;;  %v546_v47 = vadd.f32 %v2466_v35, %v3230_v7  ;;  %v653_v24 = vmax.f32 %v589_v17, 0.0 }
  0xf5   : > { %v537_v40 = vpop.f32.mrf.mxu0  ;;  %v601_v52 = vpop.f32.mrf.mxu1  ;;  %v610_v21 = vadd.f32 %v3246_v44, %v3230_v7  ;;  %v2760_v44 = vld [vmem:[%s3802_s5 + $0x10] sm:$0xff]  }
  0xf6   : > { %v666_v41 = vpack.c.bf16 %v637_v38, %v636_v37  ;;  %v538_v45 = vadd.f32 %v3230_v7, %v537_v40  ;;  %v642_v55 = vmax.f32 %v546_v47, 0.0  ;;  %v674_v29 = vpack.c.bf16 %v653_v24, %v652_v23  ;;  %2546 = vmatprep.subr.bf16.mxu0 %v2760_v44 }
  0xf7   : > { %v2467_v43 = vpop.f32.mrf.mxu0  ;;  %v2483_v62 = vpop.f32.mrf.mxu1  ;;  %v602_v25 = vadd.f32 %v3230_v7, %v601_v52  ;;  %v655_v37 = vmax.f32 %v597_v12, 0.0  ;;  %2547 = vmatpush3.bf16.msra.mxu0 %v2760_v44 }
  0xf8   : > { %v549_v46 = vadd.f32 %v2467_v43, %v3230_v7  ;;  %2508 = vmatprep.mubr.bf16.mxu1 %v666_v41  ;;  %v640_v53 = vmax.f32 %v538_v45, 0.0  ;;  %v613_v43 = vadd.f32 %v2483_v62, %v3230_v7 }
  0xf9   : > { %v540_v48 = vpop.f32.mrf.mxu0  ;;  %2509 = vmatmul.mubr.bf16.gmra.mxu1 %v667_v42  ;;  %v604_v8 = vpop.f32.mrf.mxu1  ;;  %v656_v34 = vmax.f32 %v602_v25, 0.0  ;;  %v675_v42 = vpack.c.bf16 %v655_v37, %v654_v36 }
  0xfa   : > { %v541_v49 = vadd.f32 %v3230_v7, %v540_v48  ;;  %v643_v50 = vmax.f32 %v549_v46, 0.0  ;;  %v605_v31 = vadd.f32 %v3230_v7, %v604_v8  ;;  %v658_v46 = vmax.f32 %v610_v21, 0.0 }
  0xfb   : > { %v2470_v51 = vpop.f32.mrf.mxu0  ;;  %v2486_v22 = vpop.f32.mrf.mxu1  ;;  %v659_v47 = vmax.f32 %v613_v43, 0.0 }
  0xfc   : > { %v641_v54 = vmax.f32 %v541_v49, 0.0  ;;  %v669_v60 = vpack.c.bf16 %v643_v50, %v642_v55  ;;  %v562_v1 = vadd.f32 %v2470_v51, %v3230_v7  ;;  %v657_v35 = vmax.f32 %v605_v31, 0.0  ;;  %v2761_v55 = vld [vmem:[%s3802_s5 + $0x8] sm:$0xff]  }
  0xfd   : > { %v553_v56 = vpop.f32.mrf.mxu0  ;;  %v617_v28 = vpop.f32.mrf.mxu1  ;;  %v677_v49 = vpack.c.bf16 %v659_v47, %v658_v46  ;;  %v626_v50 = vadd.f32 %v2486_v22, %v3230_v7  ;;  %2548 = vmatprep.subr.bf16.mxu0 %v2761_v55 }
  0xfe   : > { %v668_v57 = vpack.c.bf16 %v641_v54, %v640_v53  ;;  %v554_v63 = vadd.f32 %v3230_v7, %v553_v56  ;;  %v646_v13 = vmax.f32 %v562_v1, 0.0  ;;  %v676_v39 = vpack.c.bf16 %v657_v35, %v656_v34  ;;  %2549 = vmatpush3.bf16.msra.mxu0 %v2761_v55 }
  0xff   : > { %v2471_v61 = vpop.f32.mrf.mxu0  ;;  %v2487_v33 = vpop.f32.mrf.mxu1  ;;  %v618_v40 = vadd.f32 %v3230_v7, %v617_v28  ;;  %v662_v52 = vmax.f32 %v626_v50, 0.0 }
 0x100   : > { %v565_v0 = vadd.f32 %v2471_v61, %v3230_v7  ;;  %2512 = vmatprep.mubr.bf16.mxu1 %v668_v57  ;;  %v644_v10 = vmax.f32 %v554_v63, 0.0  ;;  %v629_v51 = vadd.f32 %v2487_v33, %v3230_v7 }
 0x101   : > { %v556_v2 = vpop.f32.mrf.mxu0  ;;  %2513 = vmatmul.mubr.bf16.gmra.mxu1 %v669_v60  ;;  %v620_v38 = vpop.f32.mrf.mxu1  ;;  %v660_v30 = vmax.f32 %v618_v40, 0.0 }
 0x102   : > { %v557_v4 = vadd.f32 %v3230_v7, %v556_v2  ;;  %v647_v9 = vmax.f32 %v565_v0, 0.0  ;;  %v621_v41 = vadd.f32 %v3230_v7, %v620_v38  ;;  %v663_v53 = vmax.f32 %v629_v51, 0.0  ;;  %v2762_v7 = vld [vmem:[%s3802_s5] sm:$0xff]  }
 0x103   : > { %2550 = vmatprep.subr.bf16.mxu0 %v2762_v7 }
 0x104   : > { %v645_v11 = vmax.f32 %v557_v4, 0.0  ;;  %v671_v19 = vpack.c.bf16 %v647_v9, %v646_v13  ;;  %v661_v45 = vmax.f32 %v621_v41, 0.0  ;;  %v679_v54 = vpack.c.bf16 %v663_v53, %v662_v52  ;;  %2551 = vmatpush3.bf16.msra.mxu0 %v2762_v7 }
 0x106   : > { %v670_v14 = vpack.c.bf16 %v645_v11, %v644_v10  ;;  %v678_v48 = vpack.c.bf16 %v661_v45, %v660_v30 }
 0x108   : > { %2516 = vmatprep.mubr.bf16.mxu1 %v670_v14 }
 0x109   : > { %2517 = vmatmul.mubr.bf16.gmra.mxu1 %v671_v19 }
 0x10a   : > { %2520 = vmatprep.mubr.bf16.mxu1 %v672_v15 }
 0x111   : > { %2521 = vmatmul.mubr.bf16.gmra.mxu1 %v673_v32 }
 0x112   : > { %2524 = vmatprep.mubr.bf16.mxu1 %v674_v29 }
 0x119   : > { %2525 = vmatmul.mubr.bf16.gmra.mxu1 %v675_v42 }
 0x11a   : > { %2528 = vmatprep.mubr.bf16.mxu1 %v676_v39 }
 0x121   : > { %2529 = vmatmul.mubr.bf16.gmra.mxu1 %v677_v49 }
 0x122   : > { %2532 = vmatprep.mubr.bf16.mxu1 %v678_v48 }
 0x129   : > { %2533 = vmatmul.mubr.bf16.gmra.mxu1 %v679_v54 }
 0x1b1   : > { %v2506_v56 = vpop.f32.mrf.mxu1 }
 0x1b2   : > { %v794_v62 = vadd.f32 %v2506_v56, %v3289_v58 }
 0x1b3   : > { %v785_v57 = vpop.f32.mrf.mxu1 }
 0x1b4   : > { %v786_v60 = vadd.f32 %v3289_v58, %v785_v57  ;;  %v914_v6 = vmax.f32 %v794_v62, 0.0 }
 0x1b5   : > { %v2507_v59 = vpop.f32.mrf.mxu1 }
 0x1b6   : > { %v797_v61 = vadd.f32 %v2507_v59, %v3289_v58  ;;  %v912_v3 = vmax.f32 %v786_v60, 0.0 }
 0x1b7   : > { %v788_v63 = vpop.f32.mrf.mxu1 }
 0x1b8   : > { %v789_v0 = vadd.f32 %v3289_v58, %v788_v63  ;;  %v915_v1 = vmax.f32 %v797_v61, 0.0 }
 0x1b9   : > { %v2510_v2 = vpop.f32.mrf.mxu1 }
 0x1ba   : > { %v913_v4 = vmax.f32 %v789_v0, 0.0  ;;  %v945_v10 = vpack.c.bf16 %v915_v1, %v914_v6  ;;  %v810_v15 = vadd.f32 %v2510_v2, %v3289_v58 }
 0x1bb   : > { %v801_v9 = vpop.f32.mrf.mxu1 }
 0x1bc   : > { %v944_v8 = vpack.c.bf16 %v913_v4, %v912_v3  ;;  %v802_v13 = vadd.f32 %v3289_v58, %v801_v9  ;;  %v918_v23 = vmax.f32 %v810_v15, 0.0 }
 0x1bd   : > { %v2511_v11 = vpop.f32.mrf.mxu1 }
 0x1be   : > { %v813_v14 = vadd.f32 %v2511_v11, %v3289_v58  ;;  %2552 = vmatprep.mubr.bf16.mxu0 %v944_v8  ;;  %v916_v20 = vmax.f32 %v802_v13, 0.0 }
 0x1bf   : > { %v804_v16 = vpop.f32.mrf.mxu1  ;;  %2553 = vmatmul.mubr.bf16.vlgmr.msra.gmra.mxu0 %v945_v10 }
 0x1c0   : > { %v805_v17 = vadd.f32 %v3289_v58, %v804_v16  ;;  %v919_v18 = vmax.f32 %v813_v14, 0.0 }
 0x1c1   : > { %v2514_v19 = vpop.f32.mrf.mxu1 }
 0x1c2   : > { %v917_v22 = vmax.f32 %v805_v17, 0.0  ;;  %v947_v27 = vpack.c.bf16 %v919_v18, %v918_v23  ;;  %v826_v31 = vadd.f32 %v2514_v19, %v3289_v58 }
 0x1c3   : > { %v817_v24 = vpop.f32.mrf.mxu1 }
 0x1c4   : > { %v946_v26 = vpack.c.bf16 %v917_v22, %v916_v20  ;;  %v818_v29 = vadd.f32 %v3289_v58, %v817_v24  ;;  %v922_v36 = vmax.f32 %v826_v31, 0.0 }
 0x1c5   : > { %v2515_v28 = vpop.f32.mrf.mxu1 }
 0x1c6   : > { %v829_v25 = vadd.f32 %v2515_v28, %v3289_v58  ;;  %2556 = vmatprep.mubr.bf16.mxu0 %v946_v26  ;;  %v920_v34 = vmax.f32 %v818_v29, 0.0 }
 0x1c7   : > { %v820_v32 = vpop.f32.mrf.mxu1  ;;  %2557 = vmatmul.mubr.bf16.gmra.mxu0 %v947_v27 }
 0x1c8   : > { %v821_v5 = vadd.f32 %v3289_v58, %v820_v32  ;;  %v923_v12 = vmax.f32 %v829_v25, 0.0 }
 0x1c9   : > { %v2518_v33 = vpop.f32.mrf.mxu1 }
 0x1ca   : > { %v921_v35 = vmax.f32 %v821_v5, 0.0  ;;  %v949_v39 = vpack.c.bf16 %v923_v12, %v922_v36  ;;  %v842_v21 = vadd.f32 %v2518_v33, %v3289_v58 }
 0x1cb   : > { %v833_v37 = vpop.f32.mrf.mxu1 }
 0x1cc   : > { %v948_v38 = vpack.c.bf16 %v921_v35, %v920_v34  ;;  %v834_v41 = vadd.f32 %v3289_v58, %v833_v37  ;;  %v926_v49 = vmax.f32 %v842_v21, 0.0 }
 0x1cd   : > { %v2519_v40 = vpop.f32.mrf.mxu1 }
 0x1ce   : > { %v845_v42 = vadd.f32 %v2519_v40, %v3289_v58  ;;  %2560 = vmatprep.mubr.bf16.mxu0 %v948_v38  ;;  %v924_v47 = vmax.f32 %v834_v41, 0.0 }
 0x1cf   : > { %v836_v43 = vpop.f32.mrf.mxu1  ;;  %2561 = vmatmul.mubr.bf16.gmra.mxu0 %v949_v39 }
 0x1d0   : > { %v837_v30 = vadd.f32 %v3289_v58, %v836_v43  ;;  %v927_v45 = vmax.f32 %v845_v42, 0.0 }
 0x1d1   : > { %v2522_v46 = vpop.f32.mrf.mxu1 }
 0x1d2   : > { %v925_v48 = vmax.f32 %v837_v30, 0.0  ;;  %v951_v52 = vpack.c.bf16 %v927_v45, %v926_v49  ;;  %v858_v55 = vadd.f32 %v2522_v46, %v3289_v58  ;;  %v3326_v30 = vld [vmem:[%s3803_s6] ss:$0 sm:$0xff] }
 0x1d3   : > { %v849_v50 = vpop.f32.mrf.mxu1 }
 0x1d4   : > { %v950_v51 = vpack.c.bf16 %v925_v48, %v924_v47  ;;  %v850_v54 = vadd.f32 %v3289_v58, %v849_v50  ;;  %v930_v62 = vmax.f32 %v858_v55, 0.0 }
 0x1d5   : > { %v2523_v53 = vpop.f32.mrf.mxu1 }
 0x1d6   : > { %v861_v44 = vadd.f32 %v2523_v53, %v3289_v58  ;;  %2564 = vmatprep.mubr.bf16.mxu0 %v950_v51  ;;  %v928_v60 = vmax.f32 %v850_v54, 0.0 }
 0x1d7   : > { %v852_v7 = vpop.f32.mrf.mxu1  ;;  %2565 = vmatmul.mubr.bf16.gmra.mxu0 %v951_v52 }
 0x1d8   : > { %v853_v56 = vadd.f32 %v3289_v58, %v852_v7  ;;  %v931_v57 = vmax.f32 %v861_v44, 0.0 }
 0x1d9   : > { %v2526_v59 = vpop.f32.mrf.mxu1 }
 0x1da   : > { %v929_v61 = vmax.f32 %v853_v56, 0.0  ;;  %v953_v1 = vpack.c.bf16 %v931_v57, %v930_v62  ;;  %v874_v6 = vadd.f32 %v2526_v59, %v3289_v58 }
 0x1db   : > { %v865_v63 = vpop.f32.mrf.mxu1 }
 0x1dc   : > { %v952_v0 = vpack.c.bf16 %v929_v61, %v928_v60  ;;  %v866_v3 = vadd.f32 %v3289_v58, %v865_v63  ;;  %v934_v15 = vmax.f32 %v874_v6, 0.0 }
 0x1dd   : > { %v2527_v2 = vpop.f32.mrf.mxu1 }
 0x1de   : > { %v877_v4 = vadd.f32 %v2527_v2, %v3289_v58  ;;  %2568 = vmatprep.mubr.bf16.mxu0 %v952_v0  ;;  %v932_v13 = vmax.f32 %v866_v3, 0.0 }
 0x1df   : > { %v868_v9 = vpop.f32.mrf.mxu1  ;;  %2569 = vmatmul.mubr.bf16.gmra.mxu0 %v953_v1 }
 0x1e0   : > { %v869_v8 = vadd.f32 %v3289_v58, %v868_v9  ;;  %v935_v10 = vmax.f32 %v877_v4, 0.0 }
 0x1e1   : > { %v2530_v11 = vpop.f32.mrf.mxu1 }
 0x1e2   : > { %v933_v14 = vmax.f32 %v869_v8, 0.0  ;;  %v955_v18 = vpack.c.bf16 %v935_v10, %v934_v15  ;;  %v890_v23 = vadd.f32 %v2530_v11, %v3289_v58 }
 0x1e3   : > { %v881_v16 = vpop.f32.mrf.mxu1 }
 0x1e4   : > { %v954_v17 = vpack.c.bf16 %v933_v14, %v932_v13  ;;  %v882_v20 = vadd.f32 %v3289_v58, %v881_v16  ;;  %v938_v31 = vmax.f32 %v890_v23, 0.0 }
 0x1e5   : > { %v2531_v19 = vpop.f32.mrf.mxu1 }
 0x1e6   : > { %v893_v22 = vadd.f32 %v2531_v19, %v3289_v58  ;;  %2572 = vmatprep.mubr.bf16.mxu0 %v954_v17  ;;  %v936_v29 = vmax.f32 %v882_v20, 0.0 }
 0x1e7   : > { %v884_v24 = vpop.f32.mrf.mxu1  ;;  %2573 = vmatmul.mubr.bf16.gmra.mxu0 %v955_v18 }
 0x1e8   : > { %v885_v26 = vadd.f32 %v3289_v58, %v884_v24  ;;  %v939_v27 = vmax.f32 %v893_v22, 0.0 }
 0x1e9   : > { %v2534_v28 = vpop.f32.mrf.mxu1 }
 0x1ea   : > { %v937_v25 = vmax.f32 %v885_v26, 0.0  ;;  %v957_v12 = vpack.c.bf16 %v939_v27, %v938_v31  ;;  %v906_v36 = vadd.f32 %v2534_v28, %v3289_v58 }
 0x1eb   : > { %v897_v32 = vpop.f32.mrf.mxu1 }
 0x1ec   : > { %v956_v5 = vpack.c.bf16 %v937_v25, %v936_v29  ;;  %v898_v34 = vadd.f32 %v3289_v58, %v897_v32  ;;  %v942_v42 = vmax.f32 %v906_v36, 0.0 }
 0x1ed   : > { %v2535_v33 = vpop.f32.mrf.mxu1 }
 0x1ee   : > { %v909_v35 = vadd.f32 %v2535_v33, %v3289_v58  ;;  %2576 = vmatprep.mubr.bf16.mxu0 %v956_v5  ;;  %v940_v40 = vmax.f32 %v898_v34, 0.0 }
 0x1ef   : > { %v900_v37 = vpop.f32.mrf.mxu1  ;;  %2577 = vmatmul.mubr.bf16.gmra.mxu0 %v957_v12 }
 0x1f0   : > { %v901_v38 = vadd.f32 %v3289_v58, %v900_v37  ;;  %v943_v39 = vmax.f32 %v909_v35, 0.0 }
 0x1f2   : > { %v941_v41 = vmax.f32 %v901_v38, 0.0  ;;  %v959_v43 = vpack.c.bf16 %v943_v39, %v942_v42 }
 0x1f4   : > { %v958_v21 = vpack.c.bf16 %v941_v41, %v940_v40 }
 0x1f6   : > { %2580 = vmatprep.mubr.bf16.mxu0 %v958_v21 }
 0x1f7   : > { %2581 = vmatmul.mubr.bf16.gmra.mxu0 %v959_v43 }
 0x27f   : > { %v2554_v45 = vpop.f32.mrf.mxu0 }
 0x280   : > { %v1074_v46 = vadd.f32 %v2554_v45, %v3326_v30 }
 0x281   : > { %v1065_v47 = vpop.f32.mrf.mxu0 }
 0x282   : > { %v2315_v48 = vmul.f32 -1.442695, %v1074_v46  ;;  %v1066_v58 = vadd.f32 %v3326_v30, %v1065_v47  ;;  %v1419_v49 = vmax.f32 %v1074_v46, 0.0 }
 0x283   : > { %v2555_v50 = vpop.f32.mrf.mxu0 }
 0x284   : > { %2763 = vpow2.f32 %v2315_v48  ;;  %v2313_v51 = vmul.f32 -1.442695, %v1066_v58  ;;  %v1077_v52 = vadd.f32 %v2555_v50, %v3326_v30  ;;  %1485 = vrot.lane.b32.xlu1 %v1419_v49, %s3044_s19  ;;  %v1417_v53 = vmax.f32 %v1066_v58, 0.0 }
 0x285   : > { %v1068_v54 = vpop.f32.mrf.mxu0 }
 0x286   : > { %2765 = vpow2.f32 %v2313_v51  ;;  %v2316_v44 = vmul.f32 -1.442695, %v1077_v52  ;;  %v1420_v55 = vmax.f32 %v1077_v52, 0.0  ;;  %v1069_v7 = vadd.f32 %v3326_v30, %v1068_v54  ;;  %1481 = vrot.lane.b32.xlu0 %v1417_v53, %s3044_s19 }
 0x287   : > { %v2558_v56 = vpop.f32.mrf.mxu0 }
 0x288   : > { %2767 = vpow2.f32 %v2316_v44  ;;  %v2314_v57 = vmul.f32 -1.442695, %v1069_v7  ;;  %v1418_v59 = vmax.f32 %v1069_v7, 0.0  ;;  %v1090_v60 = vadd.f32 %v2558_v56, %v3326_v30  ;;  %1487 = vrot.lane.b32.xlu1 %v1420_v55, %s3044_s19 }
 0x289   : > { %v1081_v61 = vpop.f32.mrf.mxu0 }
 0x28a   : > { %2769 = vpow2.f32 %v2314_v57  ;;  %v2319_v62 = vmul.f32 -1.442695, %v1090_v60  ;;  %v1082_v63 = vadd.f32 %v3326_v30, %v1081_v61  ;;  %1483 = vrot.lane.b32.xlu0 %v1418_v59, %s3044_s19  ;;  %v1423_v1 = vmax.f32 %v1090_v60, 0.0 }
 0x28b   : > { %v2559_v0 = vpop.f32.mrf.mxu0 }
 0x28c   : > { %2771 = vpow2.f32 %v2319_v62  ;;  %v2317_v2 = vmul.f32 -1.442695, %v1082_v63  ;;  %v1093_v3 = vadd.f32 %v2559_v0, %v3326_v30  ;;  %v1421_v11 = vmax.f32 %v1082_v63, 0.0 }
 0x28d   : > { %v1084_v4 = vpop.f32.mrf.mxu0 }
 0x28e   : > { %2773 = vpow2.f32 %v2317_v2  ;;  %v2320_v6 = vmul.f32 -1.442695, %v1093_v3  ;;  %v1424_v9 = vmax.f32 %v1093_v3, 0.0  ;;  %v1085_v8 = vadd.f32 %v3326_v30, %v1084_v4  ;;  %1493 = vrot.lane.b32.xlu0 %v1423_v1, %s3044_s19 }
 0x28f   : > { %v2562_v10 = vpop.f32.mrf.mxu0 }
 0x290   : > { %2775 = vpow2.f32 %v2320_v6  ;;  %v2318_v13 = vmul.f32 -1.442695, %v1085_v8  ;;  %v1106_v14 = vadd.f32 %v2562_v10, %v3326_v30  ;;  %1495 = vrot.lane.b32.xlu1 %v1424_v9, %s3044_s19  ;;  %v1422_v18 = vmax.f32 %v1085_v8, 0.0 }
 0x291   : > { %v2764_v15 = vpop.eup %2763  ;;  %v1097_v16 = vpop.f32.mrf.mxu0 }
 0x292   : > { %v1290_v17 = vadd.f32 1.0, %v2764_v15  ;;  %2777 = vpow2.f32 %v2318_v13  ;;  %v2323_v19 = vmul.f32 -1.442695, %v1106_v14  ;;  %1489 = vrot.lane.b32.xlu0 %v1421_v11, %s3044_s19  ;;  %v1098_v22 = vadd.f32 %v3326_v30, %v1097_v16 }
 0x293   : > { %v2766_v20 = vpop.eup %2765  ;;  %v2563_v23 = vpop.f32.mrf.mxu0  ;;  %v1427_v26 = vmax.f32 %v1106_v14, 0.0 }
 0x294   : > { %2779 = vrcp.f32 %v1290_v17  ;;  %v1288_v24 = vadd.f32 1.0, %v2766_v20  ;;  %v1109_v27 = vadd.f32 %v2563_v23, %v3326_v30  ;;  %1491 = vrot.lane.b32.xlu1 %v1422_v18, %s3044_s19  ;;  %v2321_v29 = vmul.f32 -1.442695, %v1098_v22 }
 0x295   : > { %v2768_v28 = vpop.eup %2767  ;;  %2781 = vpow2.f32 %v2323_v19  ;;  %v1100_v25 = vpop.f32.mrf.mxu0  ;;  %v1425_v36 = vmax.f32 %v1098_v22, 0.0 }
 0x296   : > { %2783 = vrcp.f32 %v1288_v24  ;;  %v1291_v31 = vadd.f32 1.0, %v2768_v28  ;;  %v2324_v32 = vmul.f32 -1.442695, %v1109_v27  ;;  %v1428_v5 = vmax.f32 %v1109_v27, 0.0  ;;  %1501 = vrot.lane.b32.xlu0 %v1427_v26, %s3044_s19 }
 0x297   : > { %v2770_v12 = vpop.eup %2769  ;;  %2785 = vpow2.f32 %v2321_v29  ;;  %v1101_v33 = vadd.f32 %v3326_v30, %v1100_v25  ;;  %v2566_v34 = vpop.f32.mrf.mxu0 }
 0x298   : > { %2787 = vrcp.f32 %v1291_v31  ;;  %v1289_v35 = vadd.f32 1.0, %v2770_v12  ;;  %v1122_v37 = vadd.f32 %v2566_v34, %v3326_v30  ;;  %1503 = vrot.lane.b32.xlu1 %v1428_v5, %s3044_s19 }
 0x299   : > { %v2772_v38 = vpop.eup %2771  ;;  %2789 = vpow2.f32 %v2324_v32  ;;  %v2322_v39 = vmul.f32 -1.442695, %v1101_v33  ;;  %v1113_v40 = vpop.f32.mrf.mxu0  ;;  %v1426_v42 = vmax.f32 %v1101_v33, 0.0 }
 0x29a   : > { %2791 = vrcp.f32 %v1289_v35  ;;  %v1294_v41 = vadd.f32 1.0, %v2772_v38  ;;  %v2327_v21 = vmul.f32 -1.442695, %v1122_v37  ;;  %1497 = vrot.lane.b32.xlu0 %v1425_v36, %s3044_s19  ;;  %v1114_v45 = vadd.f32 %v3326_v30, %v1113_v40 }
 0x29b   : > { %v2774_v43 = vpop.eup %2773  ;;  %2793 = vpow2.f32 %v2322_v39  ;;  %v2567_v46 = vpop.f32.mrf.mxu0  ;;  %v1431_v48 = vmax.f32 %v1122_v37, 0.0 }
 0x29c   : > { %2795 = vrcp.f32 %v1294_v41  ;;  %v1292_v47 = vadd.f32 1.0, %v2774_v43  ;;  %v1125_v58 = vadd.f32 %v2567_v46, %v3326_v30  ;;  %1499 = vrot.lane.b32.xlu1 %v1426_v42, %s3044_s19  ;;  %v2325_v50 = vmul.f32 -1.442695, %v1114_v45 }
 0x29d   : > { %v2776_v49 = vpop.eup %2775  ;;  %2797 = vpow2.f32 %v2327_v21  ;;  %v1116_v51 = vpop.f32.mrf.mxu0  ;;  %v1429_v57 = vmax.f32 %v1114_v45, 0.0 }
 0x29e   : > { %2799 = vrcp.f32 %v1292_v47  ;;  %v1295_v52 = vadd.f32 1.0, %v2776_v49  ;;  %v2328_v53 = vmul.f32 -1.442695, %v1125_v58  ;;  %v1432_v54 = vmax.f32 %v1125_v58, 0.0  ;;  %1509 = vrot.lane.b32.xlu0 %v1431_v48, %s3044_s19 }
 0x29f   : > { %v2778_v44 = vpop.eup %2777  ;;  %2801 = vpow2.f32 %v2325_v50  ;;  %v1117_v55 = vadd.f32 %v3326_v30, %v1116_v51  ;;  %v2570_v7 = vpop.f32.mrf.mxu0 }
 0x2a0   : > { %2803 = vrcp.f32 %v1295_v52  ;;  %v1293_v56 = vadd.f32 1.0, %v2778_v44  ;;  %v1138_v59 = vadd.f32 %v2570_v7, %v3326_v30  ;;  %1511 = vrot.lane.b32.xlu1 %v1432_v54, %s3044_s19 }
 0x2a1   : > { %v2780_v60 = vpop.eup %2779  ;;  %2805 = vpow2.f32 %v2328_v53  ;;  %v2326_v61 = vmul.f32 -1.442695, %v1117_v55  ;;  %v1129_v62 = vpop.f32.mrf.mxu0  ;;  %v1430_v0 = vmax.f32 %v1117_v55, 0.0 }
 0x2a2   : > { %v2782_v63 = vpop.eup %2781  ;;  %1387 = vst.msk [vmem:[%s3363_s27 + $0x10] sm:$0xff] %vm1384_vm3, %v2780_v60  ;;  %2807 = vrcp.f32 %v1293_v56  ;;  %v2331_v1 = vmul.f32 -1.442695, %v1138_v59  ;;  %v1130_v2 = vadd.f32 %v3326_v30, %v1129_v62  ;;  %1505 = vrot.lane.b32.xlu0 %v1429_v57, %s3044_s19  ;;  %v1435_v8 = vmax.f32 %v1138_v59, 0.0 }
 0x2a3   : > { %v2784_v3 = vpop.eup %2783  ;;  %v1298_v4 = vadd.f32 1.0, %v2782_v63  ;;  %2809 = vpow2.f32 %v2326_v61  ;;  %v2571_v6 = vpop.f32.mrf.mxu0 }
 0x2a4   : > { %v2786_v9 = vpop.eup %2785  ;;  %1385 = vst.msk [vmem:[%s3363_s27] sm:$0xff] %vm1384_vm3, %v2784_v3  ;;  %2811 = vpow2.f32 %v2331_v1  ;;  %v2329_v10 = vmul.f32 -1.442695, %v1130_v2  ;;  %v1141_v11 = vadd.f32 %v2571_v6, %v3326_v30  ;;  %1507 = vrot.lane.b32.xlu1 %v1430_v0, %s3044_s19  ;;  %v1433_v26 = vmax.f32 %v1130_v2, 0.0 }
 0x2a5   : > { %v2788_v13 = vpop.eup %2787  ;;  %2813 = vrcp.f32 %v1298_v4  ;;  %v1296_v14 = vadd.f32 1.0, %v2786_v9  ;;  %v1132_v15 = vpop.f32.mrf.mxu0 }
 0x2a6   : > { %v2790_v16 = vpop.eup %2789  ;;  %1388 = vst.msk [vmem:[%s3363_s27 + $0x18] sm:$0xff] %vm1384_vm3, %v2788_v13  ;;  %2815 = vpow2.f32 %v2329_v10  ;;  %v2332_v17 = vmul.f32 -1.442695, %v1141_v11  ;;  %v1436_v18 = vmax.f32 %v1141_v11, 0.0  ;;  %v1133_v19 = vadd.f32 %v3326_v30, %v1132_v15  ;;  %1517 = vrot.lane.b32.xlu0 %v1435_v8, %s3044_s19 }
 0x2a7   : > { %v2792_v20 = vpop.eup %2791  ;;  %2817 = vrcp.f32 %v1296_v14  ;;  %v1299_v22 = vadd.f32 1.0, %v2790_v16  ;;  %v2574_v23 = vpop.f32.mrf.mxu0 }
 0x2a8   : > { %v2794_v24 = vpop.eup %2793  ;;  %1386 = vst.msk [vmem:[%s3363_s27 + $0x8] sm:$0xff] %vm1384_vm3, %v2792_v20  ;;  %2819 = vpow2.f32 %v2332_v17  ;;  %v2330_v27 = vmul.f32 -1.442695, %v1133_v19  ;;  %v1154_v28 = vadd.f32 %v2574_v23, %v3326_v30  ;;  %1519 = vrot.lane.b32.xlu1 %v1436_v18, %s3044_s19  ;;  %v1434_v5 = vmax.f32 %v1133_v19, 0.0 }
 0x2a9   : > { %v2796_v29 = vpop.eup %2795  ;;  %2821 = vrcp.f32 %v1299_v22  ;;  %v1297_v25 = vadd.f32 1.0, %v2794_v24  ;;  %v1145_v31 = vpop.f32.mrf.mxu0 }
 0x2aa   : > { %v2798_v32 = vpop.eup %2797  ;;  %1391 = vst.msk [vmem:[%s3363_s27 + $0x30] sm:$0xff] %vm1384_vm3, %v2796_v29  ;;  %2823 = vpow2.f32 %v2330_v27  ;;  %v2335_v12 = vmul.f32 -1.442695, %v1154_v28  ;;  %v1146_v33 = vadd.f32 %v3326_v30, %v1145_v31  ;;  %1513 = vrot.lane.b32.xlu0 %v1433_v26, %s3044_s19  ;;  %v1439_v38 = vmax.f32 %v1154_v28, 0.0 }
 0x2ab   : > { %v2800_v34 = vpop.eup %2799  ;;  %2825 = vrcp.f32 %v1297_v25  ;;  %v1302_v35 = vadd.f32 1.0, %v2798_v32  ;;  %v2575_v36 = vpop.f32.mrf.mxu0 }
 0x2ac   : > { %v2802_v37 = vpop.eup %2801  ;;  %1389 = vst.msk [vmem:[%s3363_s27 + $0x20] sm:$0xff] %vm1384_vm3, %v2800_v34  ;;  %2827 = vpow2.f32 %v2335_v12  ;;  %v2333_v39 = vmul.f32 -1.442695, %v1146_v33  ;;  %v1157_v40 = vadd.f32 %v2575_v36, %v3326_v30  ;;  %1515 = vrot.lane.b32.xlu1 %v1434_v5, %s3044_s19  ;;  %v1437_v51 = vmax.f32 %v1146_v33, 0.0 }
 0x2ad   : > { %v2804_v41 = vpop.eup %2803  ;;  %2829 = vrcp.f32 %v1302_v35  ;;  %v1300_v42 = vadd.f32 1.0, %v2802_v37  ;;  %v1148_v21 = vpop.f32.mrf.mxu0 }
 0x2ae   : > { %v2806_v43 = vpop.eup %2805  ;;  %1392 = vst.msk [vmem:[%s3363_s27 + $0x38] sm:$0xff] %vm1384_vm3, %v2804_v41  ;;  %2831 = vpow2.f32 %v2333_v39  ;;  %v2336_v45 = vmul.f32 -1.442695, %v1157_v40  ;;  %v1440_v46 = vmax.f32 %v1157_v40, 0.0  ;;  %v1149_v47 = vadd.f32 %v3326_v30, %v1148_v21  ;;  %1525 = vrot.lane.b32.xlu0 %v1439_v38, %s3044_s19 }
 0x2af   : > { %v2808_v48 = vpop.eup %2807  ;;  %2833 = vrcp.f32 %v1300_v42  ;;  %v1303_v58 = vadd.f32 1.0, %v2806_v43  ;;  %v2578_v49 = vpop.f32.mrf.mxu0 }
 0x2b0   : > { %v2810_v50 = vpop.eup %2809  ;;  %1390 = vst.msk [vmem:[%s3363_s27 + $0x28] sm:$0xff] %vm1384_vm3, %v2808_v48  ;;  %2835 = vpow2.f32 %v2336_v45  ;;  %v2334_v52 = vmul.f32 -1.442695, %v1149_v47  ;;  %v1170_v53 = vadd.f32 %v2578_v49, %v3326_v30  ;;  %1527 = vrot.lane.b32.xlu1 %v1440_v46, %s3044_s19  ;;  %v1438_v57 = vmax.f32 %v1149_v47, 0.0 }
 0x2b1   : > { %v2812_v54 = vpop.eup %2811  ;;  %2837 = vrcp.f32 %v1303_v58  ;;  %v1301_v44 = vadd.f32 1.0, %v2810_v50  ;;  %v1161_v55 = vpop.f32.mrf.mxu0 }
 0x2b2   : > { %v2814_v7 = vpop.eup %2813  ;;  %v1306_v56 = vadd.f32 1.0, %v2812_v54  ;;  %2839 = vpow2.f32 %v2334_v52  ;;  %v2339_v59 = vmul.f32 -1.442695, %v1170_v53  ;;  %1521 = vrot.lane.b32.xlu0 %v1437_v51, %s3044_s19  ;;  %v1162_v61 = vadd.f32 %v3326_v30, %v1161_v55 }
 0x2b3   : > { %v2816_v60 = vpop.eup %2815  ;;  %1395 = vst.msk [vmem:[%s3363_s27 + $0x50] sm:$0xff] %vm1384_vm3, %v2814_v7  ;;  %2841 = vrcp.f32 %v1301_v44  ;;  %v2579_v62 = vpop.f32.mrf.mxu0  ;;  %v1443_v1 = vmax.f32 %v1170_v53, 0.0 }
 0x2b4   : > { %v2818_v63 = vpop.eup %2817  ;;  %2843 = vrcp.f32 %v1306_v56  ;;  %v1304_v0 = vadd.f32 1.0, %v2816_v60  ;;  %v1173_v2 = vadd.f32 %v2579_v62, %v3326_v30  ;;  %1523 = vrot.lane.b32.xlu1 %v1438_v57, %s3044_s19  ;;  %v2337_v4 = vmul.f32 -1.442695, %v1162_v61 }
 0x2b5   : > { %v2820_v3 = vpop.eup %2819  ;;  %1393 = vst.msk [vmem:[%s3363_s27 + $0x40] sm:$0xff] %vm1384_vm3, %v2818_v63  ;;  %2845 = vpow2.f32 %v2339_v59  ;;  %v1164_v6 = vpop.f32.mrf.mxu0  ;;  %v1441_v18 = vmax.f32 %v1162_v61, 0.0 }
 0x2b6   : > { %v2822_v9 = vpop.eup %2821  ;;  %2847 = vrcp.f32 %v1304_v0  ;;  %v1307_v8 = vadd.f32 1.0, %v2820_v3  ;;  %v2340_v10 = vmul.f32 -1.442695, %v1173_v2  ;;  %v1444_v11 = vmax.f32 %v1173_v2, 0.0  ;;  %1533 = vrot.lane.b32.xlu0 %v1443_v1, %s3044_s19 }
 0x2b7   : > { %v2824_v13 = vpop.eup %2823  ;;  %1396 = vst.msk [vmem:[%s3363_s27 + $0x58] sm:$0xff] %vm1384_vm3, %v2822_v9  ;;  %2849 = vpow2.f32 %v2337_v4  ;;  %v1165_v14 = vadd.f32 %v3326_v30, %v1164_v6  ;;  %v2582_v15 = vpop.f32.mrf.mxu0 }
 0x2b8   : > { %v2826_v16 = vpop.eup %2825  ;;  %2851 = vrcp.f32 %v1307_v8  ;;  %v1305_v17 = vadd.f32 1.0, %v2824_v13  ;;  %v1186_v19 = vadd.f32 %v2582_v15, %v3326_v30  ;;  %1535 = vrot.lane.b32.xlu1 %v1444_v11, %s3044_s19 }
 0x2b9   : > { %v2828_v20 = vpop.eup %2827  ;;  %1394 = vst.msk [vmem:[%s3363_s27 + $0x48] sm:$0xff] %vm1384_vm3, %v2826_v16  ;;  %2853 = vpow2.f32 %v2340_v10  ;;  %v2338_v22 = vmul.f32 -1.442695, %v1165_v14  ;;  %v1177_v23 = vpop.f32.mrf.mxu0  ;;  %v1442_v27 = vmax.f32 %v1165_v14, 0.0 }
 0x2ba   : > { %v2830_v24 = vpop.eup %2829  ;;  %2855 = vrcp.f32 %v1305_v17  ;;  %v1310_v26 = vadd.f32 1.0, %v2828_v20  ;;  %v2343_v28 = vmul.f32 -1.442695, %v1186_v19  ;;  %1529 = vrot.lane.b32.xlu0 %v1441_v18, %s3044_s19  ;;  %v1178_v25 = vadd.f32 %v3326_v30, %v1177_v23 }
 0x2bb   : > { %v2832_v29 = vpop.eup %2831  ;;  %1399 = vst.msk [vmem:[%s3363_s27 + $0x70] sm:$0xff] %vm1384_vm3, %v2830_v24  ;;  %2857 = vpow2.f32 %v2338_v22  ;;  %v2583_v31 = vpop.f32.mrf.mxu0  ;;  %v1447_v45 = vmax.f32 %v1186_v19, 0.0 }
 0x2bc   : > { %v2834_v32 = vpop.eup %2833  ;;  %2859 = vrcp.f32 %v1310_v26  ;;  %v1308_v5 = vadd.f32 1.0, %v2832_v29  ;;  %v1189_v12 = vadd.f32 %v2583_v31, %v3326_v30  ;;  %1531 = vrot.lane.b32.xlu1 %v1442_v27, %s3044_s19  ;;  %v2341_v34 = vmul.f32 -1.442695, %v1178_v25 }
 0x2bd   : > { %v2836_v33 = vpop.eup %2835  ;;  %1397 = vst.msk [vmem:[%s3363_s27 + $0x60] sm:$0xff] %vm1384_vm3, %v2834_v32  ;;  %2861 = vpow2.f32 %v2343_v28  ;;  %v1445_v35 = vmax.f32 %v1178_v25, 0.0  ;;  %v1180_v36 = vpop.f32.mrf.mxu0 }
 0x2be   : > { %v2838_v37 = vpop.eup %2837  ;;  %2863 = vrcp.f32 %v1308_v5  ;;  %v1311_v38 = vadd.f32 1.0, %v2836_v33  ;;  %v2344_v39 = vmul.f32 -1.442695, %v1189_v12  ;;  %v1181_v41 = vadd.f32 %v3326_v30, %v1180_v36 }
 0x2bf   : > { %v2840_v40 = vpop.eup %2839  ;;  %1400 = vst.msk [vmem:[%s3363_s27 + $0x78] sm:$0xff] %vm1384_vm3, %v2838_v37  ;;  %2865 = vpow2.f32 %v2341_v34  ;;  %1537 = vrot.lane.b32.xlu0 %v1445_v35, %s3044_s19  ;;  %v1448_v52 = vmax.f32 %v1189_v12, 0.0 }
 0x2c0   : > { %v2842_v42 = vpop.eup %2841  ;;  %2867 = vrcp.f32 %v1311_v38  ;;  %v1309_v21 = vadd.f32 1.0, %v2840_v40  ;;  %v2342_v46 = vmul.f32 -1.442695, %v1181_v41  ;;  %v1446_v47 = vmax.f32 %v1181_v41, 0.0 }
 0x2c1   : > { %v2844_v43 = vpop.eup %2843  ;;  %1398 = vst.msk [vmem:[%s3363_s27 + $0x68] sm:$0xff] %vm1384_vm3, %v2842_v42  ;;  %2869 = vpow2.f32 %v2344_v39 }
 0x2c2   : > { %v2846_v48 = vpop.eup %2845  ;;  %1403 = vst.msk [vmem:[%s3363_s27 + $0x90] sm:$0xff] %vm1384_vm3, %v2844_v43  ;;  %2871 = vrcp.f32 %v1309_v21  ;;  %1539 = vrot.lane.b32.xlu1 %v1446_v47, %s3044_s19 }
 0x2c3   : > { %v2848_v58 = vpop.eup %2847  ;;  %v1314_v30 = vadd.f32 1.0, %v2846_v48  ;;  %2873 = vpow2.f32 %v2342_v46  ;;  %1541 = vrot.lane.b32.xlu0 %v1447_v45, %s3044_s19 }
 0x2c4   : > { %v2850_v49 = vpop.eup %2849  ;;  %1401 = vst.msk [vmem:[%s3363_s27 + $0x80] sm:$0xff] %vm1384_vm3, %v2848_v58 }
 0x2c5   : > { %v2852_v50 = vpop.eup %2851  ;;  %2875 = vrcp.f32 %v1314_v30  ;;  %v1312_v51 = vadd.f32 1.0, %v2850_v49 }
 0x2c6   : > { %v2854_v53 = vpop.eup %2853  ;;  %1404 = vst.msk [vmem:[%s3363_s27 + $0x98] sm:$0xff] %vm1384_vm3, %v2852_v50  ;;  %1543 = vrot.lane.b32.xlu1 %v1448_v52, %s3044_s19 }
 0x2c7   : > { %v2856_v54 = vpop.eup %2855  ;;  %2877 = vrcp.f32 %v1312_v51  ;;  %v1315_v44 = vadd.f32 1.0, %v2854_v53 }
 0x2c8   : > { %v2858_v55 = vpop.eup %2857  ;;  %1402 = vst.msk [vmem:[%s3363_s27 + $0x88] sm:$0xff] %vm1384_vm3, %v2856_v54 }
 0x2c9   : > { %v2860_v7 = vpop.eup %2859  ;;  %2879 = vrcp.f32 %v1315_v44  ;;  %v1313_v56 = vadd.f32 1.0, %v2858_v55 }
 0x2ca   : > { %v2862_v57 = vpop.eup %2861  ;;  %1407 = vst.msk [vmem:[%s3363_s27 + $0xb0] sm:$0xff] %vm1384_vm3, %v2860_v7 }
 0x2cb   : > { %v2864_v59 = vpop.eup %2863  ;;  %2881 = vrcp.f32 %v1313_v56  ;;  %v1318_v60 = vadd.f32 1.0, %v2862_v57 }
 0x2cc   : > { %v2866_v61 = vpop.eup %2865  ;;  %1405 = vst.msk [vmem:[%s3363_s27 + $0xa0] sm:$0xff] %vm1384_vm3, %v2864_v59 }
 0x2cd   : > { %v2868_v62 = vpop.eup %2867  ;;  %2883 = vrcp.f32 %v1318_v60  ;;  %v1316_v63 = vadd.f32 1.0, %v2866_v61 }
 0x2ce   : > { %v2870_v0 = vpop.eup %2869  ;;  %1408 = vst.msk [vmem:[%s3363_s27 + $0xb8] sm:$0xff] %vm1384_vm3, %v2868_v62 }
 0x2cf   : > { %v2872_v1 = vpop.eup %2871  ;;  %2885 = vrcp.f32 %v1316_v63  ;;  %v1319_v2 = vadd.f32 1.0, %v2870_v0 }
 0x2d0   : > { %v2874_v3 = vpop.eup %2873  ;;  %1406 = vst.msk [vmem:[%s3363_s27 + $0xa8] sm:$0xff] %vm1384_vm3, %v2872_v1 }
 0x2d1   : > { %2887 = vrcp.f32 %v1319_v2  ;;  %v1317_v4 = vadd.f32 1.0, %v2874_v3 }
 0x2d2   : > { %v2876_v6 = vpop.eup %2875 }
 0x2d3   : > { %1411 = vst.msk [vmem:[%s3363_s27 + $0xd0] sm:$0xff] %vm1384_vm3, %v2876_v6  ;;  %2889 = vrcp.f32 %v1317_v4 }
 0x2d4   : > { %v2878_v9 = vpop.eup %2877 }
 0x2d5   : > { %1409 = vst.msk [vmem:[%s3363_s27 + $0xc0] sm:$0xff] %vm1384_vm3, %v2878_v9 }
 0x2d6   : > { %v2880_v8 = vpop.eup %2879 }
 0x2d7   : > { %1412 = vst.msk [vmem:[%s3363_s27 + $0xd8] sm:$0xff] %vm1384_vm3, %v2880_v8 }
 0x2d8   : > { %v2882_v10 = vpop.eup %2881 }
 0x2d9   : > { %1410 = vst.msk [vmem:[%s3363_s27 + $0xc8] sm:$0xff] %vm1384_vm3, %v2882_v10 }
 0x2da   : > { %v2884_v11 = vpop.eup %2883 }
 0x2db   : > { %1415 = vst.msk [vmem:[%s3363_s27 + $0xf0] sm:$0xff] %vm1384_vm3, %v2884_v11 }
 0x2dc   : > { %v2886_v13 = vpop.eup %2885 }
 0x2dd   : > { %1413 = vst.msk [vmem:[%s3363_s27 + $0xe0] sm:$0xff] %vm1384_vm3, %v2886_v13 }
 0x2de   : > { %v2888_v14 = vpop.eup %2887 }
 0x2df   : > { %1416 = vst.msk [vmem:[%s3363_s27 + $0xf8] sm:$0xff] %vm1384_vm3, %v2888_v14 }
 0x2e0   : > { %v2890_v15 = vpop.eup %2889 }
 0x2e1   : > { %1414 = vst.msk [vmem:[%s3363_s27 + $0xe8] sm:$0xff] %vm1384_vm3, %v2890_v15 }
 0x2f6   : > { %v1486_v16 = vpop.permute.xlu1 %1485 }
 0x2f7   : > { %1580 = vst.msk [vmem:[%s3463_s22 + $0x10] sm:$0xff] %vm1577_vm4, %v1486_v16 }
 0x2f8   : > { %v1482_v17 = vpop.permute.xlu0 %1481 }
 0x2f9   : > { %1578 = vst.msk [vmem:[%s3463_s22] sm:$0xff] %vm1577_vm4, %v1482_v17 }
 0x2fa   : > { %v1488_v18 = vpop.permute.xlu1 %1487 }
 0x2fb   : > { %1581 = vst.msk [vmem:[%s3463_s22 + $0x18] sm:$0xff] %vm1577_vm4, %v1488_v18 }
 0x2fc   : > { %v1484_v19 = vpop.permute.xlu0 %1483 }
 0x2fd   : > { %1579 = vst.msk [vmem:[%s3463_s22 + $0x8] sm:$0xff] %vm1577_vm4, %v1484_v19 }
 0x300   : > { %v1494_v20 = vpop.permute.xlu0 %1493 }
 0x301   : > { %1584 = vst.msk [vmem:[%s3463_s22 + $0x30] sm:$0xff] %vm1577_vm4, %v1494_v20 }
 0x302   : > { %v1496_v22 = vpop.permute.xlu1 %1495 }
 0x303   : > { %1585 = vst.msk [vmem:[%s3463_s22 + $0x38] sm:$0xff] %vm1577_vm4, %v1496_v22 }
 0x304   : > { %v1490_v23 = vpop.permute.xlu0 %1489 }
 0x305   : > { %1582 = vst.msk [vmem:[%s3463_s22 + $0x20] sm:$0xff] %vm1577_vm4, %v1490_v23 }
 0x306   : > { %v1492_v24 = vpop.permute.xlu1 %1491 }
 0x307   : > { %1583 = vst.msk [vmem:[%s3463_s22 + $0x28] sm:$0xff] %vm1577_vm4, %v1492_v24 }
 0x308   : > { %v1502_v26 = vpop.permute.xlu0 %1501 }
 0x309   : > { %1588 = vst.msk [vmem:[%s3463_s22 + $0x50] sm:$0xff] %vm1577_vm4, %v1502_v26 }
 0x30a   : > { %v1504_v27 = vpop.permute.xlu1 %1503 }
 0x30b   : > { %1589 = vst.msk [vmem:[%s3463_s22 + $0x58] sm:$0xff] %vm1577_vm4, %v1504_v27 }
 0x30c   : > { %v1498_v28 = vpop.permute.xlu0 %1497 }
 0x30d   : > { %1586 = vst.msk [vmem:[%s3463_s22 + $0x40] sm:$0xff] %vm1577_vm4, %v1498_v28 }
 0x30e   : > { %v1500_v29 = vpop.permute.xlu1 %1499 }
 0x30f   : > { %1587 = vst.msk [vmem:[%s3463_s22 + $0x48] sm:$0xff] %vm1577_vm4, %v1500_v29 }
 0x310   : > { %v1510_v25 = vpop.permute.xlu0 %1509 }
 0x311   : > { %1592 = vst.msk [vmem:[%s3463_s22 + $0x70] sm:$0xff] %vm1577_vm4, %v1510_v25 }
 0x312   : > { %v1512_v31 = vpop.permute.xlu1 %1511 }
 0x313   : > { %1593 = vst.msk [vmem:[%s3463_s22 + $0x78] sm:$0xff] %vm1577_vm4, %v1512_v31 }
 0x314   : > { %v1506_v32 = vpop.permute.xlu0 %1505 }
 0x315   : > { %1590 = vst.msk [vmem:[%s3463_s22 + $0x60] sm:$0xff] %vm1577_vm4, %v1506_v32 }
 0x316   : > { %v1508_v5 = vpop.permute.xlu1 %1507 }
 0x317   : > { %1591 = vst.msk [vmem:[%s3463_s22 + $0x68] sm:$0xff] %vm1577_vm4, %v1508_v5 }
 0x318   : > { %v1518_v12 = vpop.permute.xlu0 %1517 }
 0x319   : > { %1596 = vst.msk [vmem:[%s3463_s22 + $0x90] sm:$0xff] %vm1577_vm4, %v1518_v12 }
 0x31a   : > { %v1520_v33 = vpop.permute.xlu1 %1519 }
 0x31b   : > { %1597 = vst.msk [vmem:[%s3463_s22 + $0x98] sm:$0xff] %vm1577_vm4, %v1520_v33 }
 0x31c   : > { %v1514_v34 = vpop.permute.xlu0 %1513 }
 0x31d   : > { %1594 = vst.msk [vmem:[%s3463_s22 + $0x80] sm:$0xff] %vm1577_vm4, %v1514_v34 }
 0x31e   : > { %v1516_v35 = vpop.permute.xlu1 %1515 }
 0x31f   : > { %1595 = vst.msk [vmem:[%s3463_s22 + $0x88] sm:$0xff] %vm1577_vm4, %v1516_v35 }
 0x320   : > { %v1526_v36 = vpop.permute.xlu0 %1525 }
 0x321   : > { %1600 = vst.msk [vmem:[%s3463_s22 + $0xb0] sm:$0xff] %vm1577_vm4, %v1526_v36 }
 0x322   : > { %v1528_v37 = vpop.permute.xlu1 %1527 }
 0x323   : > { %1601 = vst.msk [vmem:[%s3463_s22 + $0xb8] sm:$0xff] %vm1577_vm4, %v1528_v37 }
 0x324   : > { %v1522_v38 = vpop.permute.xlu0 %1521 }
 0x325   : > { %1598 = vst.msk [vmem:[%s3463_s22 + $0xa0] sm:$0xff] %vm1577_vm4, %v1522_v38 }
 0x326   : > { %v1524_v39 = vpop.permute.xlu1 %1523 }
 0x327   : > { %1599 = vst.msk [vmem:[%s3463_s22 + $0xa8] sm:$0xff] %vm1577_vm4, %v1524_v39 }
 0x328   : > { %v1534_v40 = vpop.permute.xlu0 %1533 }
 0x329   : > { %1604 = vst.msk [vmem:[%s3463_s22 + $0xd0] sm:$0xff] %vm1577_vm4, %v1534_v40 }
 0x32a   : > { %v1536_v41 = vpop.permute.xlu1 %1535 }
 0x32b   : > { %1605 = vst.msk [vmem:[%s3463_s22 + $0xd8] sm:$0xff] %vm1577_vm4, %v1536_v41 }
 0x32c   : > { %v1530_v42 = vpop.permute.xlu0 %1529 }
 0x32d   : > { %1602 = vst.msk [vmem:[%s3463_s22 + $0xc0] sm:$0xff] %vm1577_vm4, %v1530_v42 }
 0x32e   : > { %v1532_v21 = vpop.permute.xlu1 %1531 }
 0x32f   : > { %1603 = vst.msk [vmem:[%s3463_s22 + $0xc8] sm:$0xff] %vm1577_vm4, %v1532_v21 }
 0x331   : > { %v1538_v43 = vpop.permute.xlu0 %1537 }
 0x332   : > { %1606 = vst.msk [vmem:[%s3463_s22 + $0xe0] sm:$0xff] %vm1577_vm4, %v1538_v43 }
 0x334   : > { %v1540_v45 = vpop.permute.xlu1 %1539 }
 0x335   : > { %v1542_v46 = vpop.permute.xlu0 %1541  ;;  %1607 = vst.msk [vmem:[%s3463_s22 + $0xe8] sm:$0xff] %vm1577_vm4, %v1540_v45  ;;  %1620 = sbr.rel (!%p3115_p4) target bundleno = 874 (0x36a), region = 52 }
 0x336   : > { %1608 = vst.msk [vmem:[%s3463_s22 + $0xf0] sm:$0xff] %vm1577_vm4, %v1542_v46 }
 0x338   : > { %v1544_v47 = vpop.permute.xlu1 %1543 }
 0x339   : > { %1609 = vst.msk [vmem:[%s3463_s22 + $0xf8] sm:$0xff] %vm1577_vm4, %v1544_v47 }
 0x33a   : > { %s3823_s23 = smov (!%p1623_p8, %s1622_s23), 32 }
 0x33b   : > { %s2348_s10 = sshll.u32 %s3823_s23, 7 }
 0x33c   : > { %p2351_p9 = scmp.eq.s32.totalorder %s2348_s10, 0 }
 0x33d   : > { %s3542_s11 = sshrl.u32 (!%p2351_p9), %s3823_s23, 5 }
 0x33e   : > { %1631 = sbr.rel (%p2351_p9) target bundleno = 874 (0x36a), region = 56  ;;  %p2352_p10 = scmp.le.s32.totalorder (!%p2351_p9), %s3542_s11, 0 }
 0x343   : > { %2186 = sbr.rel (%p2352_p10) target bundleno = 857 (0x359), region = 204  ;;  %s3809_s14 = smov (!%p2352_p10), %s3536_s29 }
 0x344   : > { %s3810_s15 = smov (!%p2352_p10), %s3363_s27  ;;  %s3551_s17 = smov (!%p2352_p10), 0  }
 0x345   : > { %s3553_s18 = smov (!%p2352_p10), 0  }
 0x348 LB: >> { %v1756_v48 = vld [vmem:[%s2985_s15] sm:$0xff]  ;;  %v1758_v58 = vld [vmem:[%s2985_s15 + $0x8] sm:$0xff]  ;;  %v1760_v30 = vld [vmem:[%s2985_s15 + $0x10] sm:$0xff]  ;;  %s1820_s19 = sadd.s32 1, %s2989_s17  ;;  %s1750_s18 = sadd.s32 1, %s2993_s18   ;;  %s2993_s18 = sphi %s3553_s18, %s1750_s18   ;;  %s2989_s17 = sphi %s3551_s17, %s3813_s17   ;;  %s2985_s15 = sphi %s3810_s15, %s3812_s15   ;;  %s2981_s14 = sphi %s3809_s14, %s3811_s14  }
 0x349   : >> { %1757 = vst [vmem:[%s2981_s14] sm:$0xff] %v1756_v48  ;;  %1759 = vst [vmem:[%s2981_s14 + $0x8] sm:$0xff] %v1758_v58  ;;  %v1762_v49 = vld [vmem:[%s2985_s15 + $0x18] sm:$0xff]  ;;  %v1764_v50 = vld [vmem:[%s2985_s15 + $0x20] sm:$0xff]  ;;  %p1821_p11 = scmp.ge.s32.totalorder %s1820_s19, %s3542_s11  ;;  %p1749_p12 = scmp.ge.s32.totalorder %s1750_s18, %s3542_s11 }
 0x34a   : >> { %1761 = vst [vmem:[%s2981_s14 + $0x10] sm:$0xff] %v1760_v30  ;;  %v1766_v51 = vld [vmem:[%s2985_s15 + $0x28] sm:$0xff]  ;;  %1763 = vst [vmem:[%s2981_s14 + $0x18] sm:$0xff] %v1762_v49  ;;  %v1768_v52 = vld [vmem:[%s2985_s15 + $0x30] sm:$0xff] }
 0x34b   : >> { %1765 = vst [vmem:[%s2981_s14 + $0x20] sm:$0xff] %v1764_v50  ;;  %1767 = vst [vmem:[%s2981_s14 + $0x28] sm:$0xff] %v1766_v51  ;;  %v1770_v53 = vld [vmem:[%s2985_s15 + $0x38] sm:$0xff]  ;;  %v1772_v54 = vld [vmem:[%s2985_s15 + $0x40] sm:$0xff]  ;;  %s3825_s19 = smov (%p1821_p11, %s1820_s19), 0 }
 0x34c   : >> { %1769 = vst [vmem:[%s2981_s14 + $0x30] sm:$0xff] %v1768_v52  ;;  %1771 = vst [vmem:[%s2981_s14 + $0x38] sm:$0xff] %v1770_v53  ;;  %v1774_v44 = vld [vmem:[%s2985_s15 + $0x48] sm:$0xff]  ;;  %v1776_v55 = vld [vmem:[%s2985_s15 + $0x50] sm:$0xff]  ;;  %s2353_s20 = sshll.u32 %s3825_s19, 8  ;;  %s3813_s17 = smov %s3825_s19 }
 0x34d   : >> { %1773 = vst [vmem:[%s2981_s14 + $0x40] sm:$0xff] %v1772_v54  ;;  %v1778_v7 = vld [vmem:[%s2985_s15 + $0x58] sm:$0xff]  ;;  %1775 = vst [vmem:[%s2981_s14 + $0x48] sm:$0xff] %v1774_v44  ;;  %v1780_v56 = vld [vmem:[%s2985_s15 + $0x60] sm:$0xff]  ;;  %s3609_s21 = scalar_lea.vmem %s3363_s27, %s2353_s20 [#allocation2]   ;;  %s1826_s24 = scalar_lea.vmem %s3536_s29, %s2353_s20  }
 0x34e   : >> { %1777 = vst [vmem:[%s2981_s14 + $0x50] sm:$0xff] %v1776_v55  ;;  %1779 = vst [vmem:[%s2981_s14 + $0x58] sm:$0xff] %v1778_v7  ;;  %v1782_v57 = vld [vmem:[%s2985_s15 + $0x68] sm:$0xff]  ;;  %v1784_v59 = vld [vmem:[%s2985_s15 + $0x70] sm:$0xff] }
 0x34f   : >> { %1781 = vst [vmem:[%s2981_s14 + $0x60] sm:$0xff] %v1780_v56  ;;  %1783 = vst [vmem:[%s2981_s14 + $0x68] sm:$0xff] %v1782_v57  ;;  %v1786_v60 = vld [vmem:[%s2985_s15 + $0x78] sm:$0xff]  ;;  %v1788_v61 = vld [vmem:[%s2985_s15 + $0x80] sm:$0xff] }
 0x350   : >> { %1785 = vst [vmem:[%s2981_s14 + $0x70] sm:$0xff] %v1784_v59  ;;  %v1790_v62 = vld [vmem:[%s2985_s15 + $0x88] sm:$0xff]  ;;  %1787 = vst [vmem:[%s2981_s14 + $0x78] sm:$0xff] %v1786_v60  ;;  %v1792_v63 = vld [vmem:[%s2985_s15 + $0x90] sm:$0xff] }
 0x351   : >> { %1789 = vst [vmem:[%s2981_s14 + $0x80] sm:$0xff] %v1788_v61  ;;  %1791 = vst [vmem:[%s2981_s14 + $0x88] sm:$0xff] %v1790_v62  ;;  %v1794_v0 = vld [vmem:[%s2985_s15 + $0x98] sm:$0xff]  ;;  %v1796_v1 = vld [vmem:[%s2985_s15 + $0xa0] sm:$0xff] }
 0x352   : >> { %1793 = vst [vmem:[%s2981_s14 + $0x90] sm:$0xff] %v1792_v63  ;;  %1795 = vst [vmem:[%s2981_s14 + $0x98] sm:$0xff] %v1794_v0  ;;  %v1798_v2 = vld [vmem:[%s2985_s15 + $0xa8] sm:$0xff]  ;;  %v1800_v3 = vld [vmem:[%s2985_s15 + $0xb0] sm:$0xff] }
 0x353   : >> { %1797 = vst [vmem:[%s2981_s14 + $0xa0] sm:$0xff] %v1796_v1  ;;  %v1802_v4 = vld [vmem:[%s2985_s15 + $0xb8] sm:$0xff]  ;;  %1799 = vst [vmem:[%s2981_s14 + $0xa8] sm:$0xff] %v1798_v2  ;;  %v1804_v6 = vld [vmem:[%s2985_s15 + $0xc0] sm:$0xff] }
 0x354   : >> { %1801 = vst [vmem:[%s2981_s14 + $0xb0] sm:$0xff] %v1800_v3  ;;  %1803 = vst [vmem:[%s2981_s14 + $0xb8] sm:$0xff] %v1802_v4  ;;  %v1806_v9 = vld [vmem:[%s2985_s15 + $0xc8] sm:$0xff]  ;;  %v1808_v8 = vld [vmem:[%s2985_s15 + $0xd0] sm:$0xff]  ;;  %1752 = sbr.rel (!%p1749_p12) target bundleno = 840 (0x348), region = 210 }
 0x355   : >> { %1805 = vst [vmem:[%s2981_s14 + $0xc0] sm:$0xff] %v1804_v6  ;;  %1807 = vst [vmem:[%s2981_s14 + $0xc8] sm:$0xff] %v1806_v9  ;;  %v1810_v10 = vld [vmem:[%s2985_s15 + $0xd8] sm:$0xff]  ;;  %v1812_v11 = vld [vmem:[%s2985_s15 + $0xe0] sm:$0xff] }
 0x356   : >> { %1809 = vst [vmem:[%s2981_s14 + $0xd0] sm:$0xff] %v1808_v8  ;;  %v1814_v13 = vld [vmem:[%s2985_s15 + $0xe8] sm:$0xff]  ;;  %1811 = vst [vmem:[%s2981_s14 + $0xd8] sm:$0xff] %v1810_v10  ;;  %v1816_v14 = vld [vmem:[%s2985_s15 + $0xf0] sm:$0xff] }
 0x357   : >> { %1813 = vst [vmem:[%s2981_s14 + $0xe0] sm:$0xff] %v1812_v11  ;;  %1815 = vst [vmem:[%s2981_s14 + $0xe8] sm:$0xff] %v1814_v13  ;;  %v1818_v15 = vld [vmem:[%s2985_s15 + $0xf8] sm:$0xff]  ;;  %s3812_s15 = smov %s3609_s21 }
 0x358   : >> { %1817 = vst [vmem:[%s2981_s14 + $0xf0] sm:$0xff] %v1816_v14  ;;  %1819 = vst [vmem:[%s2981_s14 + $0xf8] sm:$0xff] %v1818_v15  ;;  %s3811_s14 = smov %s1826_s24 }
 0x359 PF: > { %s3650_s25 = sand.u32 31, %s3823_s23   ;;  %s2378_s26 = sshll.u32 %s3542_s11, 8 }
 0x35a   : > { %s1831_s10 = scalar_lea.vmem %s3363_s27, %s2378_s26 [#allocation2]   ;;  %s1833_s20 = scalar_lea.vmem %s3536_s29, %s2378_s26  }
 0x35b   : > { %p2358_p13 = scmp.le.s32.totalorder %s3650_s25, 0 }
 0x35c   : > { %s2995_s24 = smov (!%p2358_p13), %s1833_s20   ;;  %s2999_s21 = smov (!%p2358_p13), %s1831_s10  }
 0x35d   : > { %2200 = sbr.rel (%p2358_p13) target bundleno = 874 (0x36a), region = 215  ;;  %s3003_s0 = smov (!%p2358_p13), 0  }
 0x35e   : > { %s3007_s19 = smov (!%p2358_p13), 0  }
 0x362 LB: >> { %v1843_v16 = vld [vmem:[%s3001_s21] sm:$0xff]  ;;  %s1845_s23 = sadd.s32 1, %s3005_s0  ;;  %s1837_s19 = sadd.s32 1, %s3009_s19   ;;  %s3009_s19 = sphi %s3007_s19, %s1837_s19   ;;  %s3005_s0 = sphi %s3003_s0, %s3004_s0   ;;  %s3001_s21 = sphi %s2999_s21, %s1850_s21   ;;  %s2997_s24 = sphi %s2995_s24, %s1851_s24  }
 0x363   : >> { %1844 = vst [vmem:[%s2997_s24] sm:$0xff] %v1843_v16  ;;  %p1846_p0 = scmp.ge.s32.totalorder %s1845_s23, %s3650_s25  ;;  %p1836_p1 = scmp.ge.s32.totalorder %s1837_s19, %s3650_s25 }
 0x365   : >> { %s3827_s23 = smov (%p1846_p0, %s1845_s23), 0  ;;  %1839 = sbr.rel (!%p1836_p1) target bundleno = 866 (0x362), region = 221 }
 0x366   : >> { %s2359_s27 = sshll.u32 %s3827_s23, 3  ;;  %s3004_s0 = smov %s3827_s23  }
 0x367   : >> { %s1850_s21 = scalar_lea.vmem %s1831_s10, %s2359_s27 [#allocation2]   ;;  %s1851_s24 = scalar_lea.vmem %s1833_s20, %s2359_s27  }
 0x36a PF: > { %1857 = sbr.rel (!%p3115_p4) target bundleno = 927 (0x39f), region = 104  ;;  %s1859_s0 = ssub.s32 (%p3115_p4), 125, %s3123_s16 }
 0x36b   : > { %s2380_s29 = sshll.u32 (%p3115_p4), %s3103_s30, 8  ;;  %p1860_p2 = scmp.lt.s32.totalorder (%p3115_p4), %s1859_s0, 32 }
 0x36c   : > { %s3665_s15 = scalar_lea.vmem (%p3115_p4), %s3805_s8, %s2380_s29  }
 0x36f   : > { %s3829_s0 = smov (!%p1860_p2, %s1859_s0), 32 }
 0x370   : > { %s2362_s17 = sshll.u32 %s3829_s0, 7 }
 0x371   : > { %p2365_p3 = scmp.eq.s32.totalorder %s2362_s17, 0 }
 0x372   : > { %s3671_s18 = sshrl.u32 (!%p2365_p3), %s3829_s0, 5 }
 0x373   : > { %1868 = sbr.rel (%p2365_p3) target bundleno = 927 (0x39f), region = 108  ;;  %p2366_p4 = scmp.le.s32.totalorder (!%p2365_p3), %s3671_s18, 0 }
 0x378   : > { %2214 = sbr.rel (%p2366_p4) target bundleno = 910 (0x38e), region = 226  ;;  %s3814_s30 = smov (!%p2366_p4), %s3665_s15 }
 0x379   : > { %s3815_s13 = smov (!%p2366_p4), %s3463_s22  ;;  %s3680_s16 = smov (!%p2366_p4), 0  }
 0x37a   : > { %s3682_s25 = smov (!%p2366_p4), 0  }
 0x37d LB: >> { %v1993_v17 = vld [vmem:[%s3017_s13] sm:$0xff]  ;;  %v1995_v18 = vld [vmem:[%s3017_s13 + $0x8] sm:$0xff]  ;;  %v1997_v19 = vld [vmem:[%s3017_s13 + $0x10] sm:$0xff]  ;;  %s2057_s26 = sadd.s32 1, %s3021_s16  ;;  %s1987_s25 = sadd.s32 1, %s3025_s25   ;;  %s3025_s25 = sphi %s3682_s25, %s1987_s25   ;;  %s3021_s16 = sphi %s3680_s16, %s3818_s16   ;;  %s3017_s13 = sphi %s3815_s13, %s3817_s13   ;;  %s3013_s30 = sphi %s3814_s30, %s3816_s30  }
 0x37e   : >> { %1994 = vst [vmem:[%s3013_s30] sm:$0xff] %v1993_v17  ;;  %1996 = vst [vmem:[%s3013_s30 + $0x8] sm:$0xff] %v1995_v18  ;;  %v1999_v20 = vld [vmem:[%s3017_s13 + $0x18] sm:$0xff]  ;;  %v2001_v22 = vld [vmem:[%s3017_s13 + $0x20] sm:$0xff]  ;;  %p2058_p5 = scmp.ge.s32.totalorder %s2057_s26, %s3671_s18  ;;  %p1986_p6 = scmp.ge.s32.totalorder %s1987_s25, %s3671_s18 }
 0x37f   : >> { %1998 = vst [vmem:[%s3013_s30 + $0x10] sm:$0xff] %v1997_v19  ;;  %v2003_v23 = vld [vmem:[%s3017_s13 + $0x28] sm:$0xff]  ;;  %2000 = vst [vmem:[%s3013_s30 + $0x18] sm:$0xff] %v1999_v20  ;;  %v2005_v24 = vld [vmem:[%s3017_s13 + $0x30] sm:$0xff] }
 0x380   : >> { %2002 = vst [vmem:[%s3013_s30 + $0x20] sm:$0xff] %v2001_v22  ;;  %2004 = vst [vmem:[%s3013_s30 + $0x28] sm:$0xff] %v2003_v23  ;;  %v2007_v26 = vld [vmem:[%s3017_s13 + $0x38] sm:$0xff]  ;;  %v2009_v27 = vld [vmem:[%s3017_s13 + $0x40] sm:$0xff]  ;;  %s3831_s26 = smov (%p2058_p5, %s2057_s26), 0 }
 0x381   : >> { %2006 = vst [vmem:[%s3013_s30 + $0x30] sm:$0xff] %v2005_v24  ;;  %2008 = vst [vmem:[%s3013_s30 + $0x38] sm:$0xff] %v2007_v26  ;;  %v2011_v28 = vld [vmem:[%s3017_s13 + $0x48] sm:$0xff]  ;;  %v2013_v29 = vld [vmem:[%s3017_s13 + $0x50] sm:$0xff]  ;;  %s2367_s10 = sshll.u32 %s3831_s26, 8  ;;  %s3818_s16 = smov %s3831_s26 }
 0x382   : >> { %2010 = vst [vmem:[%s3013_s30 + $0x40] sm:$0xff] %v2009_v27  ;;  %v2015_v25 = vld [vmem:[%s3017_s13 + $0x58] sm:$0xff]  ;;  %2012 = vst [vmem:[%s3013_s30 + $0x48] sm:$0xff] %v2011_v28  ;;  %v2017_v31 = vld [vmem:[%s3017_s13 + $0x60] sm:$0xff]  ;;  %s3738_s20 = scalar_lea.vmem %s3463_s22, %s2367_s10 [#allocation3]   ;;  %s2063_s24 = scalar_lea.vmem %s3665_s15, %s2367_s10  }
 0x383   : >> { %2014 = vst [vmem:[%s3013_s30 + $0x50] sm:$0xff] %v2013_v29  ;;  %2016 = vst [vmem:[%s3013_s30 + $0x58] sm:$0xff] %v2015_v25  ;;  %v2019_v32 = vld [vmem:[%s3017_s13 + $0x68] sm:$0xff]  ;;  %v2021_v5 = vld [vmem:[%s3017_s13 + $0x70] sm:$0xff] }
 0x384   : >> { %2018 = vst [vmem:[%s3013_s30 + $0x60] sm:$0xff] %v2017_v31  ;;  %2020 = vst [vmem:[%s3013_s30 + $0x68] sm:$0xff] %v2019_v32  ;;  %v2023_v12 = vld [vmem:[%s3017_s13 + $0x78] sm:$0xff]  ;;  %v2025_v33 = vld [vmem:[%s3017_s13 + $0x80] sm:$0xff] }
 0x385   : >> { %2022 = vst [vmem:[%s3013_s30 + $0x70] sm:$0xff] %v2021_v5  ;;  %v2027_v34 = vld [vmem:[%s3017_s13 + $0x88] sm:$0xff]  ;;  %2024 = vst [vmem:[%s3013_s30 + $0x78] sm:$0xff] %v2023_v12  ;;  %v2029_v35 = vld [vmem:[%s3017_s13 + $0x90] sm:$0xff] }
 0x386   : >> { %2026 = vst [vmem:[%s3013_s30 + $0x80] sm:$0xff] %v2025_v33  ;;  %2028 = vst [vmem:[%s3013_s30 + $0x88] sm:$0xff] %v2027_v34  ;;  %v2031_v36 = vld [vmem:[%s3017_s13 + $0x98] sm:$0xff]  ;;  %v2033_v37 = vld [vmem:[%s3017_s13 + $0xa0] sm:$0xff] }
 0x387   : >> { %2030 = vst [vmem:[%s3013_s30 + $0x90] sm:$0xff] %v2029_v35  ;;  %2032 = vst [vmem:[%s3013_s30 + $0x98] sm:$0xff] %v2031_v36  ;;  %v2035_v38 = vld [vmem:[%s3017_s13 + $0xa8] sm:$0xff]  ;;  %v2037_v39 = vld [vmem:[%s3017_s13 + $0xb0] sm:$0xff] }
 0x388   : >> { %2034 = vst [vmem:[%s3013_s30 + $0xa0] sm:$0xff] %v2033_v37  ;;  %v2039_v40 = vld [vmem:[%s3017_s13 + $0xb8] sm:$0xff]  ;;  %2036 = vst [vmem:[%s3013_s30 + $0xa8] sm:$0xff] %v2035_v38  ;;  %v2041_v41 = vld [vmem:[%s3017_s13 + $0xc0] sm:$0xff] }
 0x389   : >> { %2038 = vst [vmem:[%s3013_s30 + $0xb0] sm:$0xff] %v2037_v39  ;;  %2040 = vst [vmem:[%s3013_s30 + $0xb8] sm:$0xff] %v2039_v40  ;;  %v2043_v42 = vld [vmem:[%s3017_s13 + $0xc8] sm:$0xff]  ;;  %v2045_v21 = vld [vmem:[%s3017_s13 + $0xd0] sm:$0xff]  ;;  %1989 = sbr.rel (!%p1986_p6) target bundleno = 893 (0x37d), region = 232 }
 0x38a   : >> { %2042 = vst [vmem:[%s3013_s30 + $0xc0] sm:$0xff] %v2041_v41  ;;  %2044 = vst [vmem:[%s3013_s30 + $0xc8] sm:$0xff] %v2043_v42  ;;  %v2047_v43 = vld [vmem:[%s3017_s13 + $0xd8] sm:$0xff]  ;;  %v2049_v45 = vld [vmem:[%s3017_s13 + $0xe0] sm:$0xff] }
 0x38b   : >> { %2046 = vst [vmem:[%s3013_s30 + $0xd0] sm:$0xff] %v2045_v21  ;;  %v2051_v46 = vld [vmem:[%s3017_s13 + $0xe8] sm:$0xff]  ;;  %2048 = vst [vmem:[%s3013_s30 + $0xd8] sm:$0xff] %v2047_v43  ;;  %v2053_v47 = vld [vmem:[%s3017_s13 + $0xf0] sm:$0xff] }
 0x38c   : >> { %2050 = vst [vmem:[%s3013_s30 + $0xe0] sm:$0xff] %v2049_v45  ;;  %2052 = vst [vmem:[%s3013_s30 + $0xe8] sm:$0xff] %v2051_v46  ;;  %v2055_v48 = vld [vmem:[%s3017_s13 + $0xf8] sm:$0xff]  ;;  %s3817_s13 = smov %s3738_s20 }
 0x38d   : >> { %2054 = vst [vmem:[%s3013_s30 + $0xf0] sm:$0xff] %v2053_v47  ;;  %2056 = vst [vmem:[%s3013_s30 + $0xf8] sm:$0xff] %v2055_v48  ;;  %s3816_s30 = smov %s2063_s24 }
 0x38e PF: > { %s3779_s21 = sand.u32 31, %s3829_s0   ;;  %s2381_s19 = sshll.u32 %s3671_s18, 8 }
 0x38f   : > { %s2068_s23 = scalar_lea.vmem %s3463_s22, %s2381_s19 [#allocation3]   ;;  %s2070_s27 = scalar_lea.vmem %s3665_s15, %s2381_s19  }
 0x390   : > { %p2372_p7 = scmp.le.s32.totalorder %s3779_s21, 0 }
 0x391   : > { %s3027_s29 = smov (!%p2372_p7), %s2070_s27   ;;  %s3031_s11 = smov (!%p2372_p7), %s2068_s23  }
 0x392   : > { %2228 = sbr.rel (%p2372_p7) target bundleno = 927 (0x39f), region = 237  ;;  %s3035_s14 = smov (!%p2372_p7), 0  }
 0x393   : > { %s3039_s17 = smov (!%p2372_p7), 0  }
 0x397 LB: >> { %v2080_v58 = vld [vmem:[%s3033_s11] sm:$0xff]  ;;  %s2082_s0 = sadd.s32 1, %s3037_s14  ;;  %s2074_s17 = sadd.s32 1, %s3041_s17   ;;  %s3041_s17 = sphi %s3039_s17, %s2074_s17   ;;  %s3037_s14 = sphi %s3035_s14, %s3036_s14   ;;  %s3033_s11 = sphi %s3031_s11, %s2087_s11   ;;  %s3029_s29 = sphi %s3027_s29, %s2088_s29  }
 0x398   : >> { %2081 = vst [vmem:[%s3029_s29] sm:$0xff] %v2080_v58  ;;  %p2083_p8 = scmp.ge.s32.totalorder %s2082_s0, %s3779_s21  ;;  %p2073_p9 = scmp.ge.s32.totalorder %s2074_s17, %s3779_s21 }
 0x39a   : >> { %s3833_s0 = smov (%p2083_p8, %s2082_s0), 0  ;;  %2076 = sbr.rel (!%p2073_p9) target bundleno = 919 (0x397), region = 243 }
 0x39b   : >> { %s2373_s22 = sshll.u32 %s3833_s0, 3  ;;  %s3036_s14 = smov %s3833_s0  }
 0x39c   : >> { %s2087_s11 = scalar_lea.vmem %s2068_s23, %s2373_s22 [#allocation3]   ;;  %s2088_s29 = scalar_lea.vmem %s2070_s27, %s2373_s22  }
 0x39f PF: > { %p16_p10 = scmp.ge.s32.totalorder %s3105_s9, 6   ;;  %s3819_s27 = smov %s2973_s28 }
 0x3a0   : > { %s3820_s28 = smov %s3113_s12  ;;  %s3821_s29 = smov %s3105_s9 }
 0x3a1   :  { %18 = sbr.rel (!%p16_p10) target bundleno = 4 (0x4), region = 254 }

</bundles_post_ra>
